<compile_context>
chip_gen: v7x
topology: tpu7x:2x2x1
jax: 0.10.0
libtpu: 0.0.40
codegen_flags: <defaults>
</compile_context>

<pallas_src>
import math

import jax
import jax.numpy as jnp
from jax import lax
from jax.experimental import pallas as pl
from jax.experimental.pallas import tpu as pltpu


def _layer_norm(h, w, b, eps=1e-5):
    mu = jnp.mean(h, axis=-1, keepdims=True)
    var = jnp.mean(jnp.square(h - mu), axis=-1, keepdims=True)
    return (h - mu) * lax.rsqrt(var + eps) * w + b


# ---------------------------------------------------------------------------
# Stage 1 kernel: LN1 + fused QKV projection, head-major output, Q pre-scaled.
# ---------------------------------------------------------------------------
def _qkv_kernel(x_ref,                      # (1, TQ, C)
                ln1w_ref, ln1b_ref,         # (1, C)
                wqkv_ref, bqkv_ref,         # (C, 3C), (1, 3C)
                q_ref, k_ref, v_ref):       # (1, H, TQ, hd) each
    TQ, C = x_ref.shape[1], x_ref.shape[2]
    H, hd = q_ref.shape[1], q_ref.shape[3]
    cdt = wqkv_ref.dtype                    # compute dtype == weight dtype
    scale = 1.0 / math.sqrt(hd)

    xf = x_ref[0].astype(jnp.float32)                       # (TQ, C)
    h = _layer_norm(xf, ln1w_ref[0], ln1b_ref[0])
    qkv = jnp.dot(h.astype(cdt), wqkv_ref[...],
                  preferred_element_type=jnp.float32) + bqkv_ref[0]   # (TQ, 3C)

    def head_major(t):                                      # (TQ,C) -> (H,TQ,hd)
        return t.reshape(TQ, H, hd).transpose(1, 0, 2)

    q_ref[0] = head_major(qkv[:, 0:C] * scale).astype(q_ref.dtype)
    k_ref[0] = head_major(qkv[:, C:2 * C]).astype(k_ref.dtype)
    v_ref[0] = head_major(qkv[:, 2 * C:3 * C]).astype(v_ref.dtype)


# ---------------------------------------------------------------------------
# Stage 2 kernel: causal flash attention + proj + residual + LN2 + MLP.
# ---------------------------------------------------------------------------
def _attn_mlp_kernel(x_ref,                  # (1, TQ, C)
                     q_ref,                  # (1, H, TQ, hd)  (pre-scaled)
                     k_ref, v_ref,           # (1, H, TK, hd)
                     wpr_ref, bpr_ref,       # (C, C), (1, C)
                     ln2w_ref, ln2b_ref,     # (1, C)
                     wfc_ref, bfc_ref,       # (C, 4C), (1, 4C)
                     wp2_ref, bp2_ref,       # (4C, C), (1, C)
                     o_ref,                  # (1, TQ, C)
                     m_sc, l_sc, acc_sc):    # VMEM f32 scratch
    qi = pl.program_id(1)
    ki = pl.program_id(2)
    H, TQ, hd = q_ref.shape[1], q_ref.shape[2], q_ref.shape[3]
    TK = k_ref.shape[2]
    cdt = wpr_ref.dtype

    def mm(a, w):
        return jnp.dot(a.astype(cdt), w, preferred_element_type=jnp.float32)

    @pl.when(ki == 0)
    def _():
        m_sc[...] = jnp.full(m_sc.shape, -jnp.inf, jnp.float32)
        l_sc[...] = jnp.zeros(l_sc.shape, jnp.float32)
        acc_sc[...] = jnp.zeros(acc_sc.shape, jnp.float32)

    def attn_step(mask_diag):
        q = q_ref[0]                                         # (H, TQ, hd)
        k = k_ref[0]                                         # (H, TK, hd)
        v = v_ref[0]                                         # (H, TK, hd)
        s = jnp.einsum("hqd,hkd->hqk", q, k,
                       preferred_element_type=jnp.float32)   # (H, TQ, TK) f32
        if mask_diag:
            # Only the diagonal tile needs masking (ki == qi, TQ == TK),
            # so local row/col indices suffice.
            rows = lax.broadcasted_iota(jnp.int32, (TQ, TK), 0)
            cols = lax.broadcasted_iota(jnp.int32, (TQ, TK), 1)
            s = jnp.where((cols <= rows)[None, :, :], s, -1e30)
        m_prev = m_sc[...]
        m_new = jnp.maximum(m_prev, jnp.max(s, axis=-1, keepdims=True))
        alpha = jnp.exp(m_prev - m_new)
        p = jnp.exp(s - m_new)
        l_sc[...] = alpha * l_sc[...] + jnp.sum(p, axis=-1, keepdims=True)
        acc_sc[...] = alpha * acc_sc[...] + jnp.einsum(
            "hqk,hkd->hqd", p.astype(v.dtype), v,
            preferred_element_type=jnp.float32)
        m_sc[...] = m_new

    # Strictly-below-diagonal tiles: no mask needed.
    @pl.when(ki < qi)
    def _():
        attn_step(mask_diag=False)

    # Diagonal tile: masked.  Tiles with ki > qi are skipped entirely.
    @pl.when(ki == qi)
    def _():
        attn_step(mask_diag=True)

    # Finalize + projection + residual + LN2 + MLP on the last KV step.
    @pl.when(ki == pl.num_programs(2) - 1)
    def _():
        l = l_sc[...]
        inv = pl.reciprocal(l, approx=True)                  # EUP
        inv = inv * (2.0 - l * inv)                          # Newton -> ~fp32
        y = (acc_sc[...] * inv).transpose(1, 0, 2).reshape(TQ, H * hd)
        y = mm(y, wpr_ref[...]) + bpr_ref[0]
        x1 = x_ref[0].astype(jnp.float32) + y                # residual 1

        h2 = _layer_norm(x1, ln2w_ref[0], ln2b_ref[0])
        ff = mm(h2, wfc_ref[...]) + bfc_ref[0]
        ff = 0.5 * ff * (1.0 + lax.erf(ff * (1.0 / math.sqrt(2.0))))  # exact GELU
        ff = mm(ff, wp2_ref[...]) + bp2_ref[0]
        o_ref[0] = (x1 + ff).astype(o_ref.dtype)             # residual 2


# ---------------------------------------------------------------------------
# Wrapper
# ---------------------------------------------------------------------------
def _gpt_block_impl(x, params, n_head, q_tile, compute_dtype,
                    vmem_limit_bytes, single_buffer_weights):
    B, T, C = x.shape
    H = n_head
    hd = C // H
    TQ = q_tile
    n_q = T // TQ
    cdt = compute_dtype

    # Cast the big matmul weights to the compute dtype ONCE here (halves
    # HBM->VMEM bytes / VMEM residency in bf16 mode and removes per-step
    # casts).  Biases / LN params stay f32 (negligible bytes, better accuracy).
    w_qkv = params["w_qkv"].astype(cdt)
    w_proj = params["w_proj"].astype(cdt)
    w_fc = params["w_fc"].astype(cdt)
    w_fcproj = params["w_fcproj"].astype(cdt)

    def const_spec(shape):
        idx = lambda *_: (0,) * len(shape)
        if single_buffer_weights:
            # Block index never changes -> second pipeline buffer is pure VMEM
            # waste (matters most on v7x's 64 MiB per-TC VMEM).
            return pl.BlockSpec(shape, idx, pipeline_mode=pl.Buffered(1))
        return pl.BlockSpec(shape, idx)

    cp1 = pltpu.CompilerParams(
        dimension_semantics=("parallel", "parallel"),
        vmem_limit_bytes=vmem_limit_bytes)
    cp2 = pltpu.CompilerParams(
        dimension_semantics=("parallel", "parallel", "arbitrary"),
        vmem_limit_bytes=vmem_limit_bytes)

    # ---- Stage 1: LN1 + QKV projection, head-major (B, H, T, hd) -----------
    q, k, v = pl.pallas_call(
        _qkv_kernel,
        out_shape=tuple(jax.ShapeDtypeStruct((B, H, T, hd), cdt)
                        for _ in range(3)),
        grid_spec=pltpu.PrefetchScalarGridSpec(
            num_scalar_prefetch=0,
            grid=(B, n_q),
            in_specs=[
                pl.BlockSpec((1, TQ, C), lambda b, i: (b, i, 0)),
                const_spec((1, C)), const_spec((1, C)),            # ln1 w, b
                const_spec((C, 3 * C)), const_spec((1, 3 * C)),    # c_attn
            ],
            out_specs=[pl.BlockSpec((1, H, TQ, hd),
                                    lambda b, i: (b, 0, i, 0))] * 3,
        ),
        compiler_params=cp1,
    )(x, params["ln1_w"], params["ln1_b"], w_qkv, params["b_qkv"])

    # ---- Stage 2: causal flash attention + proj + residual + LN2 + MLP -----
    # KV block index clamped to min(ki, qi): tiles above the diagonal are
    # neither computed (pl.when skip) nor re-DMA'd (index unchanged).
    kv_idx = lambda b, i, j: (b, 0, jnp.minimum(j, i), 0)
    out = pl.pallas_call(
        _attn_mlp_kernel,
        out_shape=jax.ShapeDtypeStruct((B, T, C), x.dtype),
        grid_spec=pltpu.PrefetchScalarGridSpec(
            num_scalar_prefetch=0,
            grid=(B, n_q, n_q),
            in_specs=[
                pl.BlockSpec((1, TQ, C), lambda b, i, j: (b, i, 0)),       # x
                pl.BlockSpec((1, H, TQ, hd), lambda b, i, j: (b, 0, i, 0)),  # q
                pl.BlockSpec((1, H, TQ, hd), kv_idx),                       # k
                pl.BlockSpec((1, H, TQ, hd), kv_idx),                       # v
                const_spec((C, C)), const_spec((1, C)),          # attn c_proj
                const_spec((1, C)), const_spec((1, C)),          # ln2 w, b
                const_spec((C, 4 * C)), const_spec((1, 4 * C)),  # mlp c_fc
                const_spec((4 * C, C)), const_spec((1, C)),      # mlp c_proj
            ],
            out_specs=pl.BlockSpec((1, TQ, C), lambda b, i, j: (b, i, 0)),
            scratch_shapes=[
                pltpu.VMEM((H, TQ, 1), jnp.float32),    # running max
                pltpu.VMEM((H, TQ, 1), jnp.float32),    # running denom
                pltpu.VMEM((H, TQ, hd), jnp.float32),   # output accumulator
            ],
        ),
        compiler_params=cp2,
    )(x, q, k, v,
      w_proj, params["b_proj"], params["ln2_w"], params["ln2_b"],
      w_fc, params["b_fc"], w_fcproj, params["b_fcproj"])
    return out


def gpt_block(x, params, n_head, *, q_tile=None, compute_dtype=jnp.bfloat16,
              vmem_limit_bytes=48 * 1024 * 1024, single_buffer_weights=True):
    """GPT block forward: x + Attn(LN1(x)), then + MLP(LN2(x)).

    compute_dtype: MXU operand dtype (default bf16, fp32 accumulation).
      Pass jnp.float32 for exact-semantics checks.
    q_tile: query/KV tile size (128 default; 256 pays off on v6e/v7x once
      VMEM allows; keep 128 on v5e).
    """
    B, T, C = x.shape
    assert C % n_head == 0, "n_embd must be divisible by n_head"
    if q_tile is None:
        q_tile = T if T <= 128 else 128
    assert T % q_tile == 0, "sequence length must be divisible by q_tile"
    assert q_tile == T or q_tile % 8 == 0, "q_tile must be a multiple of 8"

    if single_buffer_weights:
        try:
            return _gpt_block_impl(x, params, n_head, q_tile, compute_dtype,
                                   vmem_limit_bytes, True)
        except Exception:
            # pl.Buffered(1) / pipeline_mode unsupported on this JAX build:
            # fall back to default double-buffered constant specs.
            pass
    return _gpt_block_impl(x, params, n_head, q_tile, compute_dtype,
                           vmem_limit_bytes, False)


# ---------------------------------------------------------------------------
# Pure-JAX reference (correctness check)
# ---------------------------------------------------------------------------
def gpt_block_ref(x, p, n_head):
    def ln(h, w, b):
        mu = h.mean(-1, keepdims=True)
        var = ((h - mu) ** 2).mean(-1, keepdims=True)
        return (h - mu) / jnp.sqrt(var + 1e-5) * w[0] + b[0]

    B, T, C = x.shape
    hd = C // n_head
    h = ln(x, p["ln1_w"], p["ln1_b"])
    qkv = h @ p["w_qkv"] + p["b_qkv"][0]
    q, k, v = jnp.split(qkv, 3, axis=-1)
    q = q.reshape(B, T, n_head, hd).transpose(0, 2, 1, 3)
    k = k.reshape(B, T, n_head, hd).transpose(0, 2, 1, 3)
    v = v.reshape(B, T, n_head, hd).transpose(0, 2, 1, 3)
    att = jnp.einsum("bhtd,bhsd->bhts", q, k) / math.sqrt(hd)
    mask = jnp.tril(jnp.ones((T, T), bool))
    att = jnp.where(mask, att, -1e30)
    att = jax.nn.softmax(att, axis=-1)
    y = jnp.einsum("bhts,bhsd->bhtd", att, v)
    y = y.transpose(0, 2, 1, 3).reshape(B, T, C)
    y = y @ p["w_proj"] + p["b_proj"][0]
    x1 = x + y
    h2 = ln(x1, p["ln2_w"], p["ln2_b"])
    ff = h2 @ p["w_fc"] + p["b_fc"][0]
    ff = 0.5 * ff * (1.0 + lax.erf(ff / math.sqrt(2.0)))
    ff = ff @ p["w_fcproj"] + p["b_fcproj"][0]
    return x1 + ff


# ---------------------------------------------------------------------------
# Main
# ---------------------------------------------------------------------------
if __name__ == "__main__":
    def make_params(key, C):
        ks = jax.random.split(key, 5)

        def linear_init(k, fan_in, fan_out):
            bound = 1.0 / math.sqrt(fan_in)
            kw, kb = jax.random.split(k)
            w = jax.random.uniform(kw, (fan_in, fan_out), jnp.float32, -bound, bound)
            b = jax.random.uniform(kb, (1, fan_out), jnp.float32, -bound, bound)
            return w, b

        w_qkv, b_qkv = linear_init(ks[1], C, 3 * C)
        w_proj, b_proj = linear_init(ks[2], C, C)
        w_fc, b_fc = linear_init(ks[3], C, 4 * C)
        w_fcproj, b_fcproj = linear_init(ks[4], 4 * C, C)
        return dict(
            ln1_w=jnp.ones((1, C), jnp.float32), ln1_b=jnp.zeros((1, C), jnp.float32),
            w_qkv=w_qkv, b_qkv=b_qkv,
            w_proj=w_proj, b_proj=b_proj,
            ln2_w=jnp.ones((1, C), jnp.float32), ln2_b=jnp.zeros((1, C), jnp.float32),
            w_fc=w_fc, b_fc=b_fc,
            w_fcproj=w_fcproj, b_fcproj=b_fcproj,
        ), ks[0]

    key = jax.random.PRNGKey(0)

    # Test 1: single query tile (TQ == T), exact-semantics fp32 path.
    B, T, C, n_head = 2, 8, 32, 4
    params, kx = make_params(key, C)
    x = jax.random.normal(kx, (B, T, C), jnp.float32)
    out = jax.block_until_ready(
        gpt_block(x, params, n_head, compute_dtype=jnp.float32))
    ref = gpt_block_ref(x, params, n_head)
    assert out.shape == (B, T, C)
    assert jnp.allclose(out, ref, rtol=1e-4, atol=1e-4), \
        f"max abs err {jnp.max(jnp.abs(out - ref))}"

    # Test 2: multi-tile flash path (T=16, TQ=8 -> grid (B, 2, 2); exercises
    # below-diagonal, diagonal, and skipped KV tiles), fp32.
    B2, T2 = 2, 16
    params2, kx2 = make_params(jax.random.PRNGKey(1), C)
    x2 = jax.random.normal(kx2, (B2, T2, C), jnp.float32)
    out2 = jax.block_until_ready(
        gpt_block(x2, params2, n_head, q_tile=8, compute_dtype=jnp.float32))
    ref2 = gpt_block_ref(x2, params2, n_head)
    assert jnp.allclose(out2, ref2, rtol=1e-4, atol=1e-4), \
        f"max abs err {jnp.max(jnp.abs(out2 - ref2))}"

    # Test 3: default bf16 compute path (MXU-friendly), loose tolerance.
    out3 = jax.block_until_ready(gpt_block(x2, params2, n_head, q_tile=8))
    assert bool(jnp.all(jnp.isfinite(out3)))
    assert float(jnp.max(jnp.abs(out3.astype(jnp.float32) - ref2))) < 0.2, \
        f"bf16 max abs err {jnp.max(jnp.abs(out3.astype(jnp.float32) - ref2))}"

    print("KERNEL_OK")
</pallas_src>

<mosaic_0001>
module attributes {stable_mosaic.version = 11 : i64} {
  func.func @_qkv_kernel(%arg0: i32, %arg1: i32, %arg2: memref<1x8x32xf32, #tpu.memory_space<vmem>>, %arg3: memref<1x32xf32, #tpu.memory_space<vmem>>, %arg4: memref<1x32xf32, #tpu.memory_space<vmem>>, %arg5: memref<32x96xf32, #tpu.memory_space<vmem>>, %arg6: memref<1x96xf32, #tpu.memory_space<vmem>>, %arg7: memref<1x4x8x8xf32, #tpu.memory_space<vmem>>, %arg8: memref<1x4x8x8xf32, #tpu.memory_space<vmem>>, %arg9: memref<1x4x8x8xf32, #tpu.memory_space<vmem>>) attributes {dimension_semantics = [#tpu.dimension_semantics<parallel>, #tpu.dimension_semantics<parallel>], iteration_bounds = array<i64: 2, 1>, scalar_prefetch = 0 : i64, scratch_operands = 0 : i64, tpu.core_type = #tpu.core_type<tc>, window_params = [{transform_indices = @transform_0, window_bounds = array<i64: 1, 8, 32>}, {pipeline_mode = #tpu.pipeline_mode<synchronous>, transform_indices = @transform_1, window_bounds = array<i64: 1, 32>}, {pipeline_mode = #tpu.pipeline_mode<synchronous>, transform_indices = @transform_2, window_bounds = array<i64: 1, 32>}, {pipeline_mode = #tpu.pipeline_mode<synchronous>, transform_indices = @transform_3, window_bounds = array<i64: 32, 96>}, {pipeline_mode = #tpu.pipeline_mode<synchronous>, transform_indices = @transform_4, window_bounds = array<i64: 1, 96>}, {transform_indices = @transform_5, window_bounds = array<i64: 1, 4, 8, 8>}, {transform_indices = @transform_6, window_bounds = array<i64: 1, 4, 8, 8>}, {transform_indices = @transform_7, window_bounds = array<i64: 1, 4, 8, 8>}]} {
    %c0 = arith.constant 0 : index
    %c0_0 = arith.constant 0 : index
    %c0_1 = arith.constant 0 : index
    %0 = vector.load %arg2[%c0, %c0_0, %c0_1] : memref<1x8x32xf32, #tpu.memory_space<vmem>>, vector<1x8x32xf32>
    %1 = vector.shape_cast %0 : vector<1x8x32xf32> to vector<8x32xf32>
    %c0_2 = arith.constant 0 : index
    %c0_3 = arith.constant 0 : index
    %2 = vector.load %arg3[%c0_2, %c0_3] : memref<1x32xf32, #tpu.memory_space<vmem>>, vector<1x32xf32>
    %3 = vector.shape_cast %2 : vector<1x32xf32> to vector<32xf32>
    %c0_4 = arith.constant 0 : index
    %c0_5 = arith.constant 0 : index
    %4 = vector.load %arg4[%c0_4, %c0_5] : memref<1x32xf32, #tpu.memory_space<vmem>>, vector<1x32xf32>
    %5 = vector.shape_cast %4 : vector<1x32xf32> to vector<32xf32>
    %cst = arith.constant dense<0.000000e+00> : vector<8xf32>
    %6 = vector.multi_reduction <add>, %1, %cst [1] : vector<8x32xf32> to vector<8xf32>
    %7 = vector.shape_cast %6 : vector<8xf32> to vector<8x1xf32>
    %cst_6 = arith.constant 3.200000e+01 : f32
    %8 = vector.broadcast %cst_6 : f32 to vector<8x1xf32>
    %9 = arith.divf %7, %8 : vector<8x1xf32>
    %10 = vector.broadcast %9 : vector<8x1xf32> to vector<8x32xf32>
    %11 = arith.subf %1, %10 : vector<8x32xf32>
    %12 = arith.mulf %11, %11 : vector<8x32xf32>
    %cst_7 = arith.constant dense<0.000000e+00> : vector<8xf32>
    %13 = vector.multi_reduction <add>, %12, %cst_7 [1] : vector<8x32xf32> to vector<8xf32>
    %14 = vector.shape_cast %13 : vector<8xf32> to vector<8x1xf32>
    %cst_8 = arith.constant 3.200000e+01 : f32
    %15 = vector.broadcast %cst_8 : f32 to vector<8x1xf32>
    %16 = arith.divf %14, %15 : vector<8x1xf32>
    %17 = vector.broadcast %9 : vector<8x1xf32> to vector<8x32xf32>
    %18 = arith.subf %1, %17 : vector<8x32xf32>
    %cst_9 = arith.constant 9.99999974E-6 : f32
    %19 = vector.broadcast %cst_9 : f32 to vector<8x1xf32>
    %20 = arith.addf %16, %19 : vector<8x1xf32>
    %21 = math.rsqrt %20 : vector<8x1xf32>
    %22 = vector.broadcast %21 : vector<8x1xf32> to vector<8x32xf32>
    %23 = arith.mulf %18, %22 : vector<8x32xf32>
    %24 = vector.shape_cast %3 : vector<32xf32> to vector<1x32xf32>
    %25 = vector.broadcast %24 : vector<1x32xf32> to vector<8x32xf32>
    %26 = arith.mulf %23, %25 : vector<8x32xf32>
    %27 = vector.shape_cast %5 : vector<32xf32> to vector<1x32xf32>
    %28 = vector.broadcast %27 : vector<1x32xf32> to vector<8x32xf32>
    %29 = arith.addf %26, %28 : vector<8x32xf32>
    %c0_10 = arith.constant 0 : index
    %c0_11 = arith.constant 0 : index
    %30 = vector.load %arg5[%c0_10, %c0_11] : memref<32x96xf32, #tpu.memory_space<vmem>>, vector<32x96xf32>
    %cst_12 = arith.constant dense<0.000000e+00> : vector<8x96xf32>
    %31 = tpu.matmul %29, %30, %cst_12 {dimension_numbers = #tpu.dot_dimension_numbers<[1], [0], [0], [1], [0, 0, 1, 1], [], []>} : vector<8x32xf32>, vector<32x96xf32>, vector<8x96xf32> -> vector<8x96xf32>
    %c0_13 = arith.constant 0 : index
    %c0_14 = arith.constant 0 : index
    %32 = vector.load %arg6[%c0_13, %c0_14] : memref<1x96xf32, #tpu.memory_space<vmem>>, vector<1x96xf32>
    %33 = vector.shape_cast %32 : vector<1x96xf32> to vector<96xf32>
    %34 = vector.shape_cast %33 : vector<96xf32> to vector<1x96xf32>
    %35 = vector.broadcast %34 : vector<1x96xf32> to vector<8x96xf32>
    %36 = arith.addf %31, %35 : vector<8x96xf32>
    %37 = vector.extract_strided_slice %36 {offsets = [0, 0], sizes = [8, 32], strides = [1, 1]} : vector<8x96xf32> to vector<8x32xf32>
    %cst_15 = arith.constant 0.353553385 : f32
    %38 = vector.broadcast %cst_15 : f32 to vector<8x32xf32>
    %39 = arith.mulf %37, %38 : vector<8x32xf32>
    %40 = vector.shape_cast %39 : vector<8x32xf32> to vector<8x4x8xf32>
    %41 = tpu.transpose %40, [1, 0, 2] : vector<8x4x8xf32> -> vector<4x8x8xf32>
    %c0_16 = arith.constant 0 : index
    %c0_17 = arith.constant 0 : index
    %c0_18 = arith.constant 0 : index
    %c0_19 = arith.constant 0 : index
    %42 = vector.load %arg7[%c0_16, %c0_17, %c0_18, %c0_19] : memref<1x4x8x8xf32, #tpu.memory_space<vmem>>, vector<1x4x8x8xf32>
    %43 = vector.shape_cast %42 : vector<1x4x8x8xf32> to vector<4x8x8xf32>
    %44 = vector.shape_cast %41 : vector<4x8x8xf32> to vector<1x4x8x8xf32>
    tpu.vector_store %arg7[%c0_16, %c0_17, %c0_18, %c0_19], %44 {strides = array<i32>} : memref<1x4x8x8xf32, #tpu.memory_space<vmem>>, vector<1x4x8x8xf32>,
    %45 = vector.extract_strided_slice %36 {offsets = [0, 32], sizes = [8, 32], strides = [1, 1]} : vector<8x96xf32> to vector<8x32xf32>
    %46 = vector.shape_cast %45 : vector<8x32xf32> to vector<8x4x8xf32>
    %47 = tpu.transpose %46, [1, 0, 2] : vector<8x4x8xf32> -> vector<4x8x8xf32>
    %c0_20 = arith.constant 0 : index
    %c0_21 = arith.constant 0 : index
    %c0_22 = arith.constant 0 : index
    %c0_23 = arith.constant 0 : index
    %48 = vector.load %arg8[%c0_20, %c0_21, %c0_22, %c0_23] : memref<1x4x8x8xf32, #tpu.memory_space<vmem>>, vector<1x4x8x8xf32>
    %49 = vector.shape_cast %48 : vector<1x4x8x8xf32> to vector<4x8x8xf32>
    %50 = vector.shape_cast %47 : vector<4x8x8xf32> to vector<1x4x8x8xf32>
    tpu.vector_store %arg8[%c0_20, %c0_21, %c0_22, %c0_23], %50 {strides = array<i32>} : memref<1x4x8x8xf32, #tpu.memory_space<vmem>>, vector<1x4x8x8xf32>,
    %51 = vector.extract_strided_slice %36 {offsets = [0, 64], sizes = [8, 32], strides = [1, 1]} : vector<8x96xf32> to vector<8x32xf32>
    %52 = vector.shape_cast %51 : vector<8x32xf32> to vector<8x4x8xf32>
    %53 = tpu.transpose %52, [1, 0, 2] : vector<8x4x8xf32> -> vector<4x8x8xf32>
    %c0_24 = arith.constant 0 : index
    %c0_25 = arith.constant 0 : index
    %c0_26 = arith.constant 0 : index
    %c0_27 = arith.constant 0 : index
    %54 = vector.load %arg9[%c0_24, %c0_25, %c0_26, %c0_27] : memref<1x4x8x8xf32, #tpu.memory_space<vmem>>, vector<1x4x8x8xf32>
    %55 = vector.shape_cast %54 : vector<1x4x8x8xf32> to vector<4x8x8xf32>
    %56 = vector.shape_cast %53 : vector<4x8x8xf32> to vector<1x4x8x8xf32>
    tpu.vector_store %arg9[%c0_24, %c0_25, %c0_26, %c0_27], %56 {strides = array<i32>} : memref<1x4x8x8xf32, #tpu.memory_space<vmem>>, vector<1x4x8x8xf32>,
    return
  }
  func.func @transform_0(%arg0: i32, %arg1: i32) -> (i32, i32, i32) {
    %c0_i32 = arith.constant 0 : i32
    %c0_i32_0 = arith.constant 0 : i32
    return %arg0, %arg1, %c0_i32 : i32, i32, i32
  }
  func.func @transform_1(%arg0: i32, %arg1: i32) -> (i32, i32) {
    %c0_i32 = arith.constant 0 : i32
    %c0_i32_0 = arith.constant 0 : i32
    %c0_i32_1 = arith.constant 0 : i32
    return %c0_i32, %c0_i32_0 : i32, i32
  }
  func.func @transform_2(%arg0: i32, %arg1: i32) -> (i32, i32) {
    %c0_i32 = arith.constant 0 : i32
    %c0_i32_0 = arith.constant 0 : i32
    %c0_i32_1 = arith.constant 0 : i32
    return %c0_i32, %c0_i32_0 : i32, i32
  }
  func.func @transform_3(%arg0: i32, %arg1: i32) -> (i32, i32) {
    %c0_i32 = arith.constant 0 : i32
    %c0_i32_0 = arith.constant 0 : i32
    %c0_i32_1 = arith.constant 0 : i32
    return %c0_i32, %c0_i32_0 : i32, i32
  }
  func.func @transform_4(%arg0: i32, %arg1: i32) -> (i32, i32) {
    %c0_i32 = arith.constant 0 : i32
    %c0_i32_0 = arith.constant 0 : i32
    %c0_i32_1 = arith.constant 0 : i32
    return %c0_i32, %c0_i32_0 : i32, i32
  }
  func.func @transform_5(%arg0: i32, %arg1: i32) -> (i32, i32, i32, i32) {
    %c0_i32 = arith.constant 0 : i32
    %c0_i32_0 = arith.constant 0 : i32
    %c0_i32_1 = arith.constant 0 : i32
    return %arg0, %c0_i32, %arg1, %c0_i32_0 : i32, i32, i32, i32
  }
  func.func @transform_6(%arg0: i32, %arg1: i32) -> (i32, i32, i32, i32) {
    %c0_i32 = arith.constant 0 : i32
    %c0_i32_0 = arith.constant 0 : i32
    %c0_i32_1 = arith.constant 0 : i32
    return %arg0, %c0_i32, %arg1, %c0_i32_0 : i32, i32, i32, i32
  }
  func.func @transform_7(%arg0: i32, %arg1: i32) -> (i32, i32, i32, i32) {
    %c0_i32 = arith.constant 0 : i32
    %c0_i32_0 = arith.constant 0 : i32
    %c0_i32_1 = arith.constant 0 : i32
    return %arg0, %c0_i32, %arg1, %c0_i32_0 : i32, i32, i32, i32
  }
}

module attributes {stable_mosaic.version = 11 : i64} {
  func.func @_qkv_kernel(%arg0: i32, %arg1: i32, %arg2: memref<1x8x32xf32, #tpu.memory_space<vmem>>, %arg3: memref<1x32xf32, #tpu.memory_space<vmem>>, %arg4: memref<1x32xf32, #tpu.memory_space<vmem>>, %arg5: memref<32x96xf32, #tpu.memory_space<vmem>>, %arg6: memref<1x96xf32, #tpu.memory_space<vmem>>, %arg7: memref<1x4x8x8xf32, #tpu.memory_space<vmem>>, %arg8: memref<1x4x8x8xf32, #tpu.memory_space<vmem>>, %arg9: memref<1x4x8x8xf32, #tpu.memory_space<vmem>>) attributes {dimension_semantics = [#tpu.dimension_semantics<parallel>, #tpu.dimension_semantics<parallel>], iteration_bounds = array<i64: 2, 1>, scalar_prefetch = 0 : i64, scratch_operands = 0 : i64, tpu.core_type = #tpu.core_type<tc>, window_params = [{transform_indices = @transform_0, window_bounds = array<i64: 1, 8, 32>}, {pipeline_mode = #tpu.pipeline_mode<synchronous>, transform_indices = @transform_1, window_bounds = array<i64: 1, 32>}, {pipeline_mode = #tpu.pipeline_mode<synchronous>, transform_indices = @transform_2, window_bounds = array<i64: 1, 32>}, {pipeline_mode = #tpu.pipeline_mode<synchronous>, transform_indices = @transform_3, window_bounds = array<i64: 32, 96>}, {pipeline_mode = #tpu.pipeline_mode<synchronous>, transform_indices = @transform_4, window_bounds = array<i64: 1, 96>}, {transform_indices = @transform_5, window_bounds = array<i64: 1, 4, 8, 8>}, {transform_indices = @transform_6, window_bounds = array<i64: 1, 4, 8, 8>}, {transform_indices = @transform_7, window_bounds = array<i64: 1, 4, 8, 8>}]} {
    %c0 = arith.constant 0 : index
    %c0_0 = arith.constant 0 : index
    %c0_1 = arith.constant 0 : index
    %0 = vector.load %arg2[%c0, %c0_0, %c0_1] : memref<1x8x32xf32, #tpu.memory_space<vmem>>, vector<1x8x32xf32>
    %1 = vector.shape_cast %0 : vector<1x8x32xf32> to vector<8x32xf32>
    %c0_2 = arith.constant 0 : index
    %c0_3 = arith.constant 0 : index
    %2 = vector.load %arg3[%c0_2, %c0_3] : memref<1x32xf32, #tpu.memory_space<vmem>>, vector<1x32xf32>
    %3 = vector.shape_cast %2 : vector<1x32xf32> to vector<32xf32>
    %c0_4 = arith.constant 0 : index
    %c0_5 = arith.constant 0 : index
    %4 = vector.load %arg4[%c0_4, %c0_5] : memref<1x32xf32, #tpu.memory_space<vmem>>, vector<1x32xf32>
    %5 = vector.shape_cast %4 : vector<1x32xf32> to vector<32xf32>
    %cst = arith.constant dense<0.000000e+00> : vector<8xf32>
    %6 = vector.multi_reduction <add>, %1, %cst [1] : vector<8x32xf32> to vector<8xf32>
    %7 = vector.shape_cast %6 : vector<8xf32> to vector<8x1xf32>
    %cst_6 = arith.constant 3.200000e+01 : f32
    %8 = vector.broadcast %cst_6 : f32 to vector<8x1xf32>
    %9 = arith.divf %7, %8 : vector<8x1xf32>
    %10 = vector.broadcast %9 : vector<8x1xf32> to vector<8x32xf32>
    %11 = arith.subf %1, %10 : vector<8x32xf32>
    %12 = arith.mulf %11, %11 : vector<8x32xf32>
    %cst_7 = arith.constant dense<0.000000e+00> : vector<8xf32>
    %13 = vector.multi_reduction <add>, %12, %cst_7 [1] : vector<8x32xf32> to vector<8xf32>
    %14 = vector.shape_cast %13 : vector<8xf32> to vector<8x1xf32>
    %cst_8 = arith.constant 3.200000e+01 : f32
    %15 = vector.broadcast %cst_8 : f32 to vector<8x1xf32>
    %16 = arith.divf %14, %15 : vector<8x1xf32>
    %17 = vector.broadcast %9 : vector<8x1xf32> to vector<8x32xf32>
    %18 = arith.subf %1, %17 : vector<8x32xf32>
    %cst_9 = arith.constant 9.99999974E-6 : f32
    %19 = vector.broadcast %cst_9 : f32 to vector<8x1xf32>
    %20 = arith.addf %16, %19 : vector<8x1xf32>
    %21 = math.rsqrt %20 : vector<8x1xf32>
    %22 = vector.broadcast %21 : vector<8x1xf32> to vector<8x32xf32>
    %23 = arith.mulf %18, %22 : vector<8x32xf32>
    %24 = vector.shape_cast %3 : vector<32xf32> to vector<1x32xf32>
    %25 = vector.broadcast %24 : vector<1x32xf32> to vector<8x32xf32>
    %26 = arith.mulf %23, %25 : vector<8x32xf32>
    %27 = vector.shape_cast %5 : vector<32xf32> to vector<1x32xf32>
    %28 = vector.broadcast %27 : vector<1x32xf32> to vector<8x32xf32>
    %29 = arith.addf %26, %28 : vector<8x32xf32>
    %c0_10 = arith.constant 0 : index
    %c0_11 = arith.constant 0 : index
    %30 = vector.load %arg5[%c0_10, %c0_11] : memref<32x96xf32, #tpu.memory_space<vmem>>, vector<32x96xf32>
    %cst_12 = arith.constant dense<0.000000e+00> : vector<8x96xf32>
    %31 = tpu.matmul %29, %30, %cst_12 {dimension_numbers = #tpu.dot_dimension_numbers<[1], [0], [0], [1], [0, 0, 1, 1], [], []>} : vector<8x32xf32>, vector<32x96xf32>, vector<8x96xf32> -> vector<8x96xf32>
    %c0_13 = arith.constant 0 : index
    %c0_14 = arith.constant 0 : index
    %32 = vector.load %arg6[%c0_13, %c0_14] : memref<1x96xf32, #tpu.memory_space<vmem>>, vector<1x96xf32>
    %33 = vector.shape_cast %32 : vector<1x96xf32> to vector<96xf32>
    %34 = vector.shape_cast %33 : vector<96xf32> to vector<1x96xf32>
    %35 = vector.broadcast %34 : vector<1x96xf32> to vector<8x96xf32>
    %36 = arith.addf %31, %35 : vector<8x96xf32>
    %37 = vector.extract_strided_slice %36 {offsets = [0, 0], sizes = [8, 32], strides = [1, 1]} : vector<8x96xf32> to vector<8x32xf32>
    %cst_15 = arith.constant 0.353553385 : f32
    %38 = vector.broadcast %cst_15 : f32 to vector<8x32xf32>
    %39 = arith.mulf %37, %38 : vector<8x32xf32>
    %40 = vector.shape_cast %39 : vector<8x32xf32> to vector<8x4x8xf32>
    %41 = tpu.transpose %40, [1, 0, 2] : vector<8x4x8xf32> -> vector<4x8x8xf32>
    %c0_16 = arith.constant 0 : index
    %c0_17 = arith.constant 0 : index
    %c0_18 = arith.constant 0 : index
    %c0_19 = arith.constant 0 : index
    %42 = vector.load %arg7[%c0_16, %c0_17, %c0_18, %c0_19] : memref<1x4x8x8xf32, #tpu.memory_space<vmem>>, vector<1x4x8x8xf32>
    %43 = vector.shape_cast %42 : vector<1x4x8x8xf32> to vector<4x8x8xf32>
    %44 = vector.shape_cast %41 : vector<4x8x8xf32> to vector<1x4x8x8xf32>
    tpu.vector_store %arg7[%c0_16, %c0_17, %c0_18, %c0_19], %44 {strides = array<i32>} : memref<1x4x8x8xf32, #tpu.memory_space<vmem>>, vector<1x4x8x8xf32>,
    %45 = vector.extract_strided_slice %36 {offsets = [0, 32], sizes = [8, 32], strides = [1, 1]} : vector<8x96xf32> to vector<8x32xf32>
    %46 = vector.shape_cast %45 : vector<8x32xf32> to vector<8x4x8xf32>
    %47 = tpu.transpose %46, [1, 0, 2] : vector<8x4x8xf32> -> vector<4x8x8xf32>
    %c0_20 = arith.constant 0 : index
    %c0_21 = arith.constant 0 : index
    %c0_22 = arith.constant 0 : index
    %c0_23 = arith.constant 0 : index
    %48 = vector.load %arg8[%c0_20, %c0_21, %c0_22, %c0_23] : memref<1x4x8x8xf32, #tpu.memory_space<vmem>>, vector<1x4x8x8xf32>
    %49 = vector.shape_cast %48 : vector<1x4x8x8xf32> to vector<4x8x8xf32>
    %50 = vector.shape_cast %47 : vector<4x8x8xf32> to vector<1x4x8x8xf32>
    tpu.vector_store %arg8[%c0_20, %c0_21, %c0_22, %c0_23], %50 {strides = array<i32>} : memref<1x4x8x8xf32, #tpu.memory_space<vmem>>, vector<1x4x8x8xf32>,
    %51 = vector.extract_strided_slice %36 {offsets = [0, 64], sizes = [8, 32], strides = [1, 1]} : vector<8x96xf32> to vector<8x32xf32>
    %52 = vector.shape_cast %51 : vector<8x32xf32> to vector<8x4x8xf32>
    %53 = tpu.transpose %52, [1, 0, 2] : vector<8x4x8xf32> -> vector<4x8x8xf32>
    %c0_24 = arith.constant 0 : index
    %c0_25 = arith.constant 0 : index
    %c0_26 = arith.constant 0 : index
    %c0_27 = arith.constant 0 : index
    %54 = vector.load %arg9[%c0_24, %c0_25, %c0_26, %c0_27] : memref<1x4x8x8xf32, #tpu.memory_space<vmem>>, vector<1x4x8x8xf32>
    %55 = vector.shape_cast %54 : vector<1x4x8x8xf32> to vector<4x8x8xf32>
    %56 = vector.shape_cast %53 : vector<4x8x8xf32> to vector<1x4x8x8xf32>
    tpu.vector_store %arg9[%c0_24, %c0_25, %c0_26, %c0_27], %56 {strides = array<i32>} : memref<1x4x8x8xf32, #tpu.memory_space<vmem>>, vector<1x4x8x8xf32>,
    return
  }
  func.func @transform_0(%arg0: i32, %arg1: i32) -> (i32, i32, i32) {
    %c0_i32 = arith.constant 0 : i32
    %c0_i32_0 = arith.constant 0 : i32
    return %arg0, %arg1, %c0_i32 : i32, i32, i32
  }
  func.func @transform_1(%arg0: i32, %arg1: i32) -> (i32, i32) {
    %c0_i32 = arith.constant 0 : i32
    %c0_i32_0 = arith.constant 0 : i32
    %c0_i32_1 = arith.constant 0 : i32
    return %c0_i32, %c0_i32_0 : i32, i32
  }
  func.func @transform_2(%arg0: i32, %arg1: i32) -> (i32, i32) {
    %c0_i32 = arith.constant 0 : i32
    %c0_i32_0 = arith.constant 0 : i32
    %c0_i32_1 = arith.constant 0 : i32
    return %c0_i32, %c0_i32_0 : i32, i32
  }
  func.func @transform_3(%arg0: i32, %arg1: i32) -> (i32, i32) {
    %c0_i32 = arith.constant 0 : i32
    %c0_i32_0 = arith.constant 0 : i32
    %c0_i32_1 = arith.constant 0 : i32
    return %c0_i32, %c0_i32_0 : i32, i32
  }
  func.func @transform_4(%arg0: i32, %arg1: i32) -> (i32, i32) {
    %c0_i32 = arith.constant 0 : i32
    %c0_i32_0 = arith.constant 0 : i32
    %c0_i32_1 = arith.constant 0 : i32
    return %c0_i32, %c0_i32_0 : i32, i32
  }
  func.func @transform_5(%arg0: i32, %arg1: i32) -> (i32, i32, i32, i32) {
    %c0_i32 = arith.constant 0 : i32
    %c0_i32_0 = arith.constant 0 : i32
    %c0_i32_1 = arith.constant 0 : i32
    return %arg0, %c0_i32, %arg1, %c0_i32_0 : i32, i32, i32, i32
  }
  func.func @transform_6(%arg0: i32, %arg1: i32) -> (i32, i32, i32, i32) {
    %c0_i32 = arith.constant 0 : i32
    %c0_i32_0 = arith.constant 0 : i32
    %c0_i32_1 = arith.constant 0 : i32
    return %arg0, %c0_i32, %arg1, %c0_i32_0 : i32, i32, i32, i32
  }
  func.func @transform_7(%arg0: i32, %arg1: i32) -> (i32, i32, i32, i32) {
    %c0_i32 = arith.constant 0 : i32
    %c0_i32_0 = arith.constant 0 : i32
    %c0_i32_1 = arith.constant 0 : i32
    return %arg0, %c0_i32, %arg1, %c0_i32_0 : i32, i32, i32, i32
  }
}

</mosaic_0001>

<bundles_post_ra>
// kernel: tpu_custom_call.1
= control target key start
LH: loop header
LB: loop body
LE: loop exit
PB: predicated region body
PF: predicated region fallthrough
CT: control target
= control target key end

     0   :  { %s1960_s0 = inlined_call_operand.hbm [shape: f32[2,8,32], index: 0, kind: input, shape index: {}]   ;;  %s1961_s1 = inlined_call_operand.vmem [shape: f32[1,32], index: 1, kind: input, shape index: {}]   ;;  %s1962_s2 = inlined_call_operand.vmem [shape: f32[1,32], index: 2, kind: input, shape index: {}]   ;;  %s1963_s3 = inlined_call_operand.hbm [shape: f32[32,96], index: 3, kind: input, shape index: {}]   ;;  %s1964_s4 = inlined_call_operand.vmem [shape: f32[1,96], index: 4, kind: input, shape index: {}]   ;;  %s1965_s5 = inlined_call_operand.hbm [shape: f32[2,4,8,8], index: 5, kind: output, shape index: {0}]   ;;  %s1966_s6 = inlined_call_operand.hbm [shape: f32[2,4,8,8], index: 6, kind: output, shape index: {1}]   ;;  %s1967_s7 = inlined_call_operand.hbm [shape: f32[2,4,8,8], index: 7, kind: output, shape index: {2}]  }
   0x1   :  { %1973 = sst [smem:[#allocation16_spill]] %s1963_s3 }
   0x2   :  { %13 = vsyncpa [#allocation3], 0 }
   0x3   :  { %15 = vsyncpa [#allocation3 + $0x1], 0 }
   0x4   :  { %16 = vsyncpa [#allocation6], 0 }
   0x5   :  { %17 = vsyncpa [#allocation4], 0 }
   0x6   :  { %19 = vsyncpa [#allocation4 + $0x1], 0 }
   0x7   :  { %20 = vsyncpa [#allocation9], 0 }
   0x8   :  { %22 = vsyncpa [#allocation9 + $0x1], 0  ;;  %s1568_s24 = smov 0   ;;  %s1570_s25 = smov 0  }
   0x9   :  { %s1572_s26 = smov 0   ;;  %s1574_s27 = smov 0  }
   0xa   :  { %s1576_s28 = smov 0   ;;  %s1578_s29 = smov 0  }
   0xb LB: > { %s1599_s30 = sadd.s32 4294967295, %s1507_s29   ;;  %s1971_s8 = sadd.s32 4294967294, %s1507_s29   ;;  %s1507_s29 = sphi %s1578_s29, %s28_s29   ;;  %s1503_s28 = sphi %s1576_s28, %s1996_s28   ;;  %s1499_s27 = sphi %s1574_s27, %s1995_s27   ;;  %s1495_s26 = sphi %s1572_s26, %s1994_s26   ;;  %s1491_s25 = sphi %s1570_s25, %s1993_s25   ;;  %s1487_s24 = sphi %s1568_s24, %s1992_s24  }
   0xc   : > { %p62_p0 = scmp.ne.s32.totalorder %s1491_s25, %s1487_s24  ;;  %p1968_p1 = scmp.eq.s32.totalorder %s1599_s30, 0 }
   0xd   : > { %p178_p3 = scmp.eq.s32.totalorder %s1971_s8, 1  ;;  %p1147_p5 = scmp.ge.s32.totalorder %s1507_s29, 1 }
   0xe   : > { %p1610_p4 = por %p1968_p1, %p62_p0  ;;  %p241_p7 = scmp.lt.s32.totalorder %s1507_s29, 3 }
   0xf   : > { %p1615_p6 = por %p178_p3, %p62_p0  ;;  %s1509_s12 = smov [#allocation5]  }
  0x10   : > { %s1974_s9 = scalar_select %p1610_p4, 1, 0 }
  0x11   : > { %s1975_s10 = scalar_select %p1615_p6, 1, 0 }
  0x12   : > { %p1620_p8 = pnand %p1147_p5, %p241_p7  ;;  %s259_s13 = sshll.u32 %s1509_s12, 4  ;;  %s260_s13 = int_to_ptr.vmem [resolvable:$true] %s259_s13 }
  0x13   : > { %s40_s15 = sadd.s32 1, %s1503_s28  ;;  %s1978_s3 = sld [smem:[#allocation16_spill]] }
  0x14   : > { %s1976_s11 = scalar_select %p1620_p8, 1, 0 }
  0x15   : > { %p1216_p9 = pneg %p1620_p8 }
  0x17   : > { %p1629_p11 = pnand %p1216_p9, %p1968_p1 }
  0x19   : > { %s1303_s18 = scalar_lea.hbm %s1978_s3, 512  ;;  %p1305_p13 = pneg %p1629_p11 }
  0x1a   : > { %p1304_p12 = scmp.ne.s32.totalorder %s1978_s3, %s1303_s18  ;;  %p1310_p5 = scmp.lt.u32.totalorder %s1303_s18, %s1978_s3 }
  0x1c   : > { %p1306_p0 = pnand %p1305_p13, %p1304_p12 }
  0x1e   : > { %p1307_p3 = pneg %p1306_p0 }
  0x20   : > { %p1312_p7 = pnand %p1310_p5, %p1307_p3 }
  0x22   : > { %1315 = shalt.err (!%p1312_p7)
}
  0x23   : > { %s1316_s23 = scalar_lea.vmem %s260_s13, 512  ;;  %p1324_p2 = scmp.lt.s32.totalorder %s260_s13, %s260_s13 }
  0x24   : > { %p1317_p9 = scmp.ne.s32.totalorder %s260_s13, %s1316_s23  ;;  %p1325_p6 = scmp.lt.s32.totalorder %s1316_s23, %s1316_s23 }
  0x26   : > { %p1319_p10 = pnand %p1317_p9, %p1305_p13  ;;  %p1326_p4 = por %p1325_p6, %p1324_p2 }
  0x28   : > { %p1320_p1 = pneg %p1319_p10 }
  0x2a   : > { %p1327_p8 = pnand %p1326_p4, %p1320_p1 }
  0x2c   : > { %1330 = shalt.err (!%p1327_p8)
}
  0x2d   : > { %s1510_s12 = smov 128   ;;  %s1511_s16 = smov 8  }
  0x2e   : > { %1219 = dma.hbm_to_vmem [thread:$0]  (!%p1629_p11), %s1978_s3, 512, %s260_s13, [#allocation6], %s1510_s12, %s1510_s12, %s1511_s16  }
  0x2f   : > { %p42_p1 = scmp.ge.s32.totalorder %s40_s15, 2  ;;  %s49_s19 = sadd.s32 1, %s1495_s26 }
  0x30   : > { %p56_p2 = scmp.ne.s32.totalorder %s1495_s26, %s1491_s25  ;;  %p57_p4 = scmp.eq.s32.totalorder %s1507_s29, 0 }
  0x31   : > { %s1998_s15 = smov (%p42_p1, %s40_s15), 0  ;;  %p1981_p8 = scmp.eq.s32.totalorder %s1599_s30, 1 }
  0x32   : > { %1979 = sst [smem:[#allocation15_spill]] %s1998_s15  ;;  %p1656_p6 = por %p57_p4, %p56_p2 }
  0x33   : > { %p1662_p10 = por %p1981_p8, %p56_p2  ;;  %s44_s14 = ssub.s32 %s1503_s28, %s1998_s15 }
  0x34   : > { %p1235_p12 = scmp.lt.s32.totalorder %s1507_s29, 2  ;;  %p47_p11 = scmp.eq.s32.totalorder %s44_s14, 0 }
  0x35   : > { %s276_s13 = sand.u32 1, %s1495_s26   ;;  %s1151_s12 = sshll.u32 %s1503_s28, 7 }
  0x36   : > { %s1150_s22 = sshll.u32 %s276_s13, 3  ;;  %s1677_s18 = scalar_lea.hbm %s1960_s0, %s1151_s12 }
  0x37   : > { %s1671_s23 = scalar_select %p47_p11, %s1495_s26, %s49_s19  }
  0x38   : > { %s280_s8 = scalar_lea.vmem [#allocation2], %s1150_s22  ;;  %p1683_p13 = pnand %p1235_p12, %p1656_p6 }
  0x39   : > { %s288_s3 = sshll.u32 %s280_s8, 4  ;;  %s277_s19 = scalar_lea.sflag [#allocation3], %s276_s13  ;;  %s1679_s3 = int_to_ptr.vmem [resolvable:$true] %s288_s3 }
  0x3a   : > { %s1331_s15 = scalar_lea.hbm %s1677_s18, 128  ;;  %p1333_p3 = pneg %p1683_p13 }
  0x3b   : > { %p1332_p0 = scmp.ne.s32.totalorder %s1677_s18, %s1331_s15  ;;  %s1336_s12 = scalar_lea.hbm %s1960_s0, 256 }
  0x3c   : > { %p1337_p9 = scmp.lt.u32.totalorder %s1677_s18, %s1960_s0  ;;  %p1338_p1 = scmp.lt.u32.totalorder %s1336_s12, %s1331_s15 }
  0x3d   : > { %p1334_p5 = pnand %p1333_p3, %p1332_p0  ;;  %p1340_p4 = scmp.lt.u32.totalorder %s1331_s15, %s1677_s18 }
  0x3e   : > { %p1339_p2 = por %p1338_p1, %p1337_p9 }
  0x3f   : > { %p1335_p7 = pneg %p1334_p5 }
  0x40   : > { %p1341_p6 = por %p1340_p4, %p1339_p2 }
  0x42   : > { %p1342_p8 = pnand %p1341_p6, %p1335_p7 }
  0x44   : > { %1345 = shalt.err (!%p1342_p8)
}
  0x45   : > { %s1346_s13 = scalar_lea.vmem %s1679_s3, 128  ;;  %s1512_s17 = smov [#allocation2]  }
  0x46   : > { %p1347_p12 = scmp.ne.s32.totalorder %s1679_s3, %s1346_s13  ;;  %s1351_s22 = sshll.u32 %s1512_s17, 4  ;;  %s1352_s22 = int_to_ptr.vmem [resolvable:$false] %s1351_s22 }
  0x47   : > { %s1353_s8 = scalar_lea.vmem %s1352_s22, 256  ;;  %p1354_p5 = scmp.lt.s32.totalorder %s1679_s3, %s1352_s22 }
  0x48   : > { %p1349_p11 = pnand %p1347_p12, %p1333_p3  ;;  %p1355_p9 = scmp.lt.s32.totalorder %s1353_s8, %s1346_s13 }
  0x4a   : > { %p1350_p0 = pneg %p1349_p11  ;;  %p1356_p1 = por %p1355_p9, %p1354_p5 }
  0x4c   : > { %p1357_p2 = pnand %p1356_p1, %p1350_p0 }
  0x4e   : > { %1360 = shalt.err (!%p1357_p2)
}
  0x4f   : > { %1223 = dma.hbm_to_vmem [thread:$0]  (!%p1683_p13), %s1677_s18, 128, %s1679_s3, %s277_s19  }
  0x50   : > { %p1984_p7 = scmp.ne.s32.totalorder %s1976_s11, 0 }
  0x51   : > { %s1715_s15 = sand.u32 (!%p1984_p7), 1, %s1491_s25   ;;  %p1985_p3 = scmp.ne.s32.totalorder (!%p1984_p7), %s1974_s9, 0 }
  0x52   : > { %297 = sbr.rel (%p1984_p7) target bundleno = 921 (0x399), region = 40  ;;  %s1153_s12 = sshll.u32 (!%p1984_p7), %s1715_s15, 3 }
  0x53   : > { %s300_s20 = scalar_lea.sflag (!%p1984_p7), [#allocation3], %s1715_s15  ;;  %s303_s16 = scalar_lea.vmem (!%p1984_p7), [#allocation2], %s1153_s12 }
  0x59   : > { %1470 = dma.done.wait (%p1985_p3), %s300_s20, 128  }
  0x5a   : > { %1472 = vsyncadd (%p1985_p3), %s300_s20, 4294967168  ;;  %p1986_p4 = scmp.eq.s32.totalorder %s1599_s30, 0 }
  0x5c   : > { %1474 = dma.done.wait (%p1986_p4), [#allocation6], 512   ;;  %p1987_p13 = pmov %p1986_p4 }
  0x5d   : > { %vm351_vm0 = vcmask 261120   ;;  %v348_v0 = vld [vmem:[%s303_s16] sm:$0xff]  ;;  %v380_v7 = vld [vmem:[#allocation5] sm:$0xff]  ;;  %v381_v8 = vld [vmem:[#allocation5 + $0x8] sm:$0xff]  ;;  %v1513_v10 = vmov 0.0|0.0   ;;  %vm1514_vm1 = vmmov 0   ;;  %v480_v35 = vlaneseq }
  0x5e   : > { %1476 = vsyncadd (%p1987_p13), [#allocation6], 4294966784  ;;  %v352_v1 = vsel %vm351_vm0, %v348_v0, 0.0  ;;  %v382_v9 = vld [vmem:[#allocation5 + $0x10] sm:$0xff]  ;;  %1198 = vmatprep.subr.bf16.mxu0 %v1513_v10  ;;  %v1199_v11 = vpack.c.bf16 %v381_v8, %v380_v7  ;;  %v383_v12 = vld [vmem:[#allocation5 + $0x18] sm:$0xff]  ;;  %v1515_v13 = vmov 0.0  }
  0x5f   : > { %353 = vadd.xlane.f32.xlu0 %v352_v1  ;;  %1195 = vmatprep.mubr.msk.f32.mxu0 %vm1514_vm1, %v1515_v13  ;;  %v1202_v14 = vpack.c.bf16 %v383_v12, %v382_v9  ;;  %v1158_v19 = vld [vmem:[%s1961_s1] ss:$0 sm:$0xff]  ;;  %s1516_s13 = smov 104   ;;  %s1517_s17 = smov 120   ;;  %v1521_v33 = vmov 1983009808  }
  0x60   : > { %1200 = vmatpush3.bf16.msra.mxu0 %v1199_v11  ;;  %v1159_v21 = vld [vmem:[%s1962_s2] ss:$0 sm:$0xff]  ;;  %s1518_s22 = smov 112   ;;  %s1519_s8 = smov 96   ;;  %v478_v34 = vunpack.c.l.s4 %v1521_v33  ;;  %v1522_v37 = vmov 1934713408  }
  0x61   : > { %1201 = vmatprep.subr.bf16.mxu0 %v1513_v10  ;;  %v1160_v24 = vld [vmem:[%s1964_s4] ss:$0 sm:$0xff]  ;;  %s1520_s12 = smov 64   ;;  %v510_v38 = vunpack.c.l.s4 %v1522_v37  ;;  %v481_v40 = vshrl.u32 %v480_v35, 7  ;;  %s1756_s20 = sshll.u32 %s1715_s15, 5  ;;  %vm611_vm2 = vcmask 64512  }
  0x62   : > { %v479_v39 = vunpack.c.0.s8 %v478_v34  ;;  %s1763_s16 = sshll.u32 %s1499_s27, 9  ;;  %s333_s3 = scalar_lea.vmem [#allocation7], %s1756_s20 }
  0x63   : > { %v511_v43 = vunpack.c.0.s8 %v510_v38  ;;  %s952_s9 = sshll.u32 %s333_s3, 4  ;;  %s1774_s18 = scalar_lea.hbm %s1965_s5, %s1763_s16  ;;  %s1776_s9 = int_to_ptr.vmem [resolvable:$true] %s952_s9 }
  0x64   : > { %1203 = vmatpush3.bf16.msra.mxu0 %v1202_v14  ;;  %v1743_v44 = vsub.s32 %v479_v39, %v481_v40  ;;  %s928_s14 = scalar_lea.sflag [#allocation4], %s1715_s15  ;;  %s1361_s19 = scalar_lea.vmem %s1776_s9, 512 }
  0x65   : > { %v1745_v50 = vsub.s32 %v511_v43, %v481_v40  ;;  %p1362_p6 = scmp.ne.s32.totalorder %s1776_s9, %s1361_s19 }
  0x67   : > { %p1363_p8 = pnand %p1362_p6, %p1662_p10 }
  0x69   : > { %p1364_p12 = pneg %p1363_p8 }
  0xec   : > { %v354_v2 = vpop.xlane.xlu0 %353 }
  0xed   : > { %v356_v3 = vmul.f32 0.03125, %v354_v2 }
  0xef   : > { %v357_v4 = vsub.f32 %v348_v0, %v356_v3 }
  0xf1   : > { %v358_v5 = vmul.f32 %v357_v4, %v357_v4 }
  0xf3   : > { %v359_v6 = vsel %vm351_vm0, %v358_v5, 0.0 }
  0xf4   : > { %360 = vadd.xlane.f32.xlu0 %v359_v6 }
 0x181   : > { %v361_v15 = vpop.xlane.xlu0 %360 }
 0x182   : > { %v362_v16 = vmul.f32 0.03125, %v361_v15 }
 0x184   : > { %v363_v17 = vadd.f32 1e-05, %v362_v16 }
 0x186   : > { %1301 = vrsqrt.f32 %v363_v17 }
 0x190   : > { %v1302_v18 = vpop.eup %1301 }
 0x191   : > { %v365_v20 = vmul.f32 %v1302_v18, %v357_v4 }
 0x193   : > { %v372_v22 = vmul.f32 %v1158_v19, %v365_v20 }
 0x195   : > { %v379_v23 = vadd.f32 %v1159_v21, %v372_v22 }
 0x197   : > { %1196 = vmatmul.mubr.msk.f32.vlgmr.msra.gmra.mrb[0].mxu0 %vm351_vm0, %v379_v23 }
 0x26a   : > { %v460_v25 = vpop.f32.mrb[0].mxu0 }
 0x26b   : > { %v461_v26 = vadd.f32 %v1160_v24, %v460_v25  ;;  %v1197_v27 = vpop.f32.mrb[1].mxu0 }
 0x26d   : > { %621 = vrot.lane.b32.xlu0 %v461_v26, %s1516_s13  ;;  %617 = vrot.lane.b32.xlu1 %v461_v26, %s1517_s17  ;;  %v464_v28 = vmul.f32 0.35355338, %v461_v26 }
 0x271   : > { %619 = vrot.lane.b32.xlu1 %v461_v26, %s1518_s22  ;;  %472 = vrot.lane.b32.xlu0 %v464_v28, %s1516_s13  ;;  %s1523_s13 = smov [#allocation7]  }
 0x275   : > { %623 = vrot.lane.b32.xlu1 %v461_v26, %s1519_s8 }
 0x279   : > { %775 = vrot.lane.b32.xlu1 %v461_v26, %s1520_s12 }
 0x27d   : > { %466 = vrot.lane.b32.xlu1 %v464_v28, %s1517_s17  ;;  %s1365_s17 = sshll.u32 %s1523_s13, 4  ;;  %s1366_s17 = int_to_ptr.vmem [resolvable:$false] %s1365_s17 }
 0x27e   : > { %p1368_p11 = scmp.lt.s32.totalorder %s1776_s9, %s1366_s17 }
 0x281   : > { %469 = vrot.lane.b32.xlu1 %v464_v28, %s1518_s22  ;;  %s1367_s22 = scalar_lea.vmem %s1366_s17, 1024 }
 0x282   : > { %p1369_p0 = scmp.lt.s32.totalorder %s1367_s22, %s1361_s19 }
 0x284   : > { %p1370_p5 = por %p1369_p0, %p1368_p11 }
 0x286   : > { %p1371_p9 = pnand %p1370_p5, %p1364_p12 }
 0x2df   : > { %v618_v29 = vpop.permute.xlu1 %617  ;;  %v622_v30 = vpop.permute.xlu0 %621 }
 0x2e0   : > { %777 = vrot.lane.b32.xlu0 %v618_v29, %s1520_s12  ;;  %625 = vrot.lane.b32.xlu1 %v618_v29, %s1519_s8 }
 0x2e3   : > { %v620_v31 = vpop.permute.xlu1 %619  ;;  %v473_v42 = vpop.permute.xlu0 %472 }
 0x2e4   : > { %781 = vrot.lane.b32.xlu0 %v622_v30, %s1520_s12  ;;  %627 = vrot.lane.b32.xlu1 %v620_v31, %s1519_s8 }
 0x2e7   : > { %v1739_v32 = vpop.permute.xlu1 %623 }
 0x2e8   : > { %629 = vrot.lane.b32.xlu1 %v622_v30, %s1519_s8 }
 0x2eb   : > { %v1741_v36 = vpop.permute.xlu1 %775 }
 0x2ec   : > { %779 = vrot.lane.b32.xlu1 %v620_v31, %s1520_s12 }
 0x2ef   : > { %v467_v41 = vpop.permute.xlu1 %466 }
 0x2f0   : > { %v491_v45 = vcombine.low %v467_v41, %v473_v42  ;;  %v492_v46 = vcombine.high %v467_v41, %v473_v42 }
 0x2f2   : > { %v499_v51 = vrot.slane %v491_v45, %v1743_v44  ;;  %v506_v52 = vrot.slane %v492_v46, %v1743_v44 }
 0x2f3   : > { %v470_v47 = vpop.permute.xlu1 %469 }
 0x2f4   : > { %v475_v48 = vcombine.low %v464_v28, %v470_v47  ;;  %v476_v49 = vcombine.high %v464_v28, %v470_v47 }
 0x2f6   : > { %v483_v53 = vrot.slane %v475_v48, %v1743_v44  ;;  %v490_v54 = vrot.slane %v476_v49, %v1743_v44 }
 0x2f8   : > { %v507_v55 = vcombine.low %v483_v53, %v499_v51  ;;  %v508_v56 = vcombine.high %v483_v53, %v499_v51  ;;  %v523_v57 = vcombine.low %v490_v54, %v506_v52  ;;  %v524_v58 = vcombine.high %v490_v54, %v506_v52 }
 0x2fa   : > { %v515_v59 = vrot.slane %v507_v55, %v1745_v50  ;;  %v522_v60 = vrot.slane %v508_v56, %v1745_v50  ;;  %v531_v61 = vrot.slane %v523_v57, %v1745_v50  ;;  %v538_v62 = vrot.slane %v524_v58, %v1745_v50 }
 0x2fc   : > { %v543_v63 = vcombine.low %v515_v59, %v522_v60  ;;  %v1162_v0 = vcombine.high %v515_v59, %v522_v60  ;;  %v559_v1 = vcombine.low %v531_v61, %v538_v62  ;;  %v1163_v2 = vcombine.high %v531_v61, %v538_v62 }
 0x2fe   : > { %v550_v3 = vrot.slane %v543_v63, %v1743_v44  ;;  %v558_v4 = vrot.slane %v1162_v0, %v1743_v44  ;;  %v566_v5 = vrot.slane %v559_v1, %v1743_v44  ;;  %v574_v6 = vrot.slane %v1163_v2, %v1743_v44 }
 0x300   : > { %v575_v7 = vcombine.low %v550_v3, %v558_v4  ;;  %v576_v8 = vcombine.high %v550_v3, %v558_v4  ;;  %v591_v9 = vcombine.low %v566_v5, %v574_v6  ;;  %v592_v10 = vcombine.high %v566_v5, %v574_v6 }
 0x302   : > { %v583_v11 = vrot.slane %v575_v7, %v1745_v50  ;;  %v590_v12 = vrot.slane %v576_v8, %v1745_v50  ;;  %v599_v13 = vrot.slane %v591_v9, %v1745_v50  ;;  %v606_v14 = vrot.slane %v592_v10, %v1745_v50 }
 0x304   : > { %v607_v15 = vcombine.low %v583_v11, %v599_v13  ;;  %v608_v16 = vcombine.high %v583_v11, %v599_v13  ;;  %v609_v17 = vcombine.low %v590_v12, %v606_v14  ;;  %v610_v18 = vcombine.high %v590_v12, %v606_v14 }
 0x306   : > { %612 = vst.msk [vmem:[%s333_s3] sm:$0xff] %vm611_vm2, %v607_v15  ;;  %613 = vst.msk [vmem:[%s333_s3 + $0x8] sm:$0xff] %vm611_vm2, %v608_v16 }
 0x307   : > { %614 = vst.msk [vmem:[%s333_s3 + $0x10] sm:$0xff] %vm611_vm2, %v609_v17  ;;  %615 = vst.msk [vmem:[%s333_s3 + $0x18] sm:$0xff] %vm611_vm2, %v610_v18 }
 0x308   : > { %1374 = shalt.err (!%p1371_p9)
}
 0x309   : > { %s1375_s8 = scalar_lea.hbm %s1774_s18, 512  ;;  %s1379_s27 = scalar_lea.hbm %s1965_s5, 1024 }
 0x30a   : > { %p1376_p1 = scmp.ne.s32.totalorder %s1774_s18, %s1375_s8  ;;  %p1380_p3 = scmp.lt.u32.totalorder %s1774_s18, %s1965_s5 }
 0x30b   : > { %p1381_p4 = scmp.lt.u32.totalorder %s1379_s27, %s1375_s8  ;;  %p1383_p6 = scmp.lt.u32.totalorder %s1375_s8, %s1774_s18 }
 0x30c   : > { %p1377_p2 = pnand %p1376_p1, %p1662_p10 }
 0x30d   : > { %p1382_p13 = por %p1381_p4, %p1380_p3 }
 0x30e   : > { %p1378_p7 = pneg %p1377_p2 }
 0x30f   : > { %p1384_p8 = por %p1383_p6, %p1382_p13 }
 0x311   : > { %p1385_p12 = pnand %p1384_p8, %p1378_p7 }
 0x313   : > { %1388 = shalt.err (!%p1385_p12)
}
 0x314   : > { %s1524_s19 = smov 128   ;;  %s1525_s17 = smov 8  }
 0x315   : > { %1210 = dma.vmem_to_hbm [thread:$0]  (%p1662_p10), %s1776_s9, 512, %s1774_s18, %s928_s14, %s1524_s19, %s1524_s19, %s1525_s17  }
 0x316   : > { %s932_s15 = sand.u32 1, %s1599_s30   ;;  %s340_s9 = scalar_lea.vmem [#allocation8], %s1756_s20 }
 0x317   : > { %s969_s18 = sshll.u32 %s340_s9, 4  ;;  %s1847_s8 = scalar_lea.hbm %s1966_s6, %s1763_s16  ;;  %s1849_s18 = int_to_ptr.vmem [resolvable:$true] %s969_s18 }
 0x318   : > { %s1856_s12 = scalar_lea.vmem [#allocation10], %s1756_s20  ;;  %s1865_s27 = scalar_lea.sflag [#allocation9], %s932_s15 }
 0x319   : > { %s986_s3 = sshll.u32 %s1856_s12, 4  ;;  %s1389_s11 = scalar_lea.vmem %s1849_s18, 512  ;;  %s1900_s3 = int_to_ptr.vmem [resolvable:$true] %s986_s3 }
 0x31a   : > { %p1390_p11 = scmp.ne.s32.totalorder %s1849_s18, %s1389_s11  ;;  %s1526_s20 = smov [#allocation8]  }
 0x31b   : > { %s1393_s13 = sshll.u32 %s1526_s20, 4  ;;  %s1394_s13 = int_to_ptr.vmem [resolvable:$false] %s1393_s13 }
 0x31c   : > { %p1391_p0 = pnand %p1390_p11, %p1662_p10  ;;  %p1396_p9 = scmp.lt.s32.totalorder %s1849_s18, %s1394_s13 }
 0x31e   : > { %p1392_p5 = pneg %p1391_p0 }
 0x352   : > { %v626_v19 = vpop.permute.xlu1 %625  ;;  %v778_v20 = vpop.permute.xlu0 %777 }
 0x356   : > { %v628_v21 = vpop.permute.xlu1 %627  ;;  %v782_v25 = vpop.permute.xlu0 %781 }
 0x357   : > { %v635_v22 = vcombine.low %v1739_v32, %v628_v21  ;;  %v636_v23 = vcombine.high %v1739_v32, %v628_v21  ;;  %v803_v33 = vcombine.low %v778_v20, %v782_v25  ;;  %v804_v34 = vcombine.high %v778_v20, %v782_v25 }
 0x359   : > { %v643_v28 = vrot.slane %v635_v22, %v1743_v44  ;;  %v650_v29 = vrot.slane %v636_v23, %v1743_v44  ;;  %v811_v47 = vrot.slane %v803_v33, %v1743_v44  ;;  %v818_v48 = vrot.slane %v804_v34, %v1743_v44 }
 0x35a   : > { %v630_v24 = vpop.permute.xlu1 %629 }
 0x35b   : > { %v651_v26 = vcombine.low %v626_v19, %v630_v24  ;;  %v652_v27 = vcombine.high %v626_v19, %v630_v24 }
 0x35d   : > { %v659_v30 = vrot.slane %v651_v26, %v1743_v44  ;;  %v666_v31 = vrot.slane %v652_v27, %v1743_v44 }
 0x35e   : > { %v780_v35 = vpop.permute.xlu1 %779 }
 0x35f   : > { %v667_v37 = vcombine.low %v643_v28, %v659_v30  ;;  %v668_v38 = vcombine.high %v643_v28, %v659_v30  ;;  %v683_v39 = vcombine.low %v650_v29, %v666_v31  ;;  %v684_v40 = vcombine.high %v650_v29, %v666_v31 }
 0x360   : > { %v787_v32 = vcombine.low %v1741_v36, %v780_v35  ;;  %v788_v41 = vcombine.high %v1741_v36, %v780_v35 }
 0x361   : > { %v675_v42 = vrot.slane %v667_v37, %v1745_v50  ;;  %v682_v43 = vrot.slane %v668_v38, %v1745_v50  ;;  %v691_v45 = vrot.slane %v683_v39, %v1745_v50  ;;  %v698_v46 = vrot.slane %v684_v40, %v1745_v50 }
 0x362   : > { %v795_v49 = vrot.slane %v787_v32, %v1743_v44  ;;  %v802_v51 = vrot.slane %v788_v41, %v1743_v44 }
 0x363   : > { %v703_v52 = vcombine.low %v675_v42, %v682_v43  ;;  %v1164_v53 = vcombine.high %v675_v42, %v682_v43  ;;  %v719_v54 = vcombine.low %v691_v45, %v698_v46  ;;  %v1165_v36 = vcombine.high %v691_v45, %v698_v46 }
 0x364   : > { %v819_v55 = vcombine.low %v795_v49, %v811_v47  ;;  %v820_v56 = vcombine.high %v795_v49, %v811_v47  ;;  %v835_v57 = vcombine.low %v802_v51, %v818_v48  ;;  %v836_v58 = vcombine.high %v802_v51, %v818_v48 }
 0x365   : > { %v710_v59 = vrot.slane %v703_v52, %v1743_v44  ;;  %v718_v60 = vrot.slane %v1164_v53, %v1743_v44  ;;  %v726_v61 = vrot.slane %v719_v54, %v1743_v44  ;;  %v734_v62 = vrot.slane %v1165_v36, %v1743_v44 }
 0x366   : > { %v827_v63 = vrot.slane %v819_v55, %v1745_v50  ;;  %v834_v0 = vrot.slane %v820_v56, %v1745_v50  ;;  %v843_v1 = vrot.slane %v835_v57, %v1745_v50  ;;  %v850_v2 = vrot.slane %v836_v58, %v1745_v50 }
 0x367   : > { %v735_v3 = vcombine.low %v710_v59, %v718_v60  ;;  %v736_v4 = vcombine.high %v710_v59, %v718_v60  ;;  %v751_v5 = vcombine.low %v726_v61, %v734_v62  ;;  %v752_v6 = vcombine.high %v726_v61, %v734_v62 }
 0x368   : > { %v855_v7 = vcombine.low %v827_v63, %v834_v0  ;;  %v1166_v8 = vcombine.high %v827_v63, %v834_v0  ;;  %v871_v9 = vcombine.low %v843_v1, %v850_v2  ;;  %v1167_v10 = vcombine.high %v843_v1, %v850_v2 }
 0x369   : > { %v743_v11 = vrot.slane %v735_v3, %v1745_v50  ;;  %v750_v12 = vrot.slane %v736_v4, %v1745_v50  ;;  %v759_v13 = vrot.slane %v751_v5, %v1745_v50  ;;  %v766_v14 = vrot.slane %v752_v6, %v1745_v50 }
 0x36a   : > { %v862_v15 = vrot.slane %v855_v7, %v1743_v44  ;;  %v870_v16 = vrot.slane %v1166_v8, %v1743_v44  ;;  %v878_v17 = vrot.slane %v871_v9, %v1743_v44  ;;  %v886_v18 = vrot.slane %v1167_v10, %v1743_v44 }
 0x36b   : > { %v767_v19 = vcombine.low %v743_v11, %v759_v13  ;;  %v768_v20 = vcombine.high %v743_v11, %v759_v13  ;;  %v769_v21 = vcombine.low %v750_v12, %v766_v14  ;;  %v770_v22 = vcombine.high %v750_v12, %v766_v14 }
 0x36c   : > { %v887_v23 = vcombine.low %v862_v15, %v870_v16  ;;  %v888_v24 = vcombine.high %v862_v15, %v870_v16  ;;  %v903_v25 = vcombine.low %v878_v17, %v886_v18  ;;  %v904_v26 = vcombine.high %v878_v17, %v886_v18 }
 0x36d   : > { %771 = vst.msk [vmem:[%s340_s9] sm:$0xff] %vm611_vm2, %v767_v19  ;;  %772 = vst.msk [vmem:[%s340_s9 + $0x8] sm:$0xff] %vm611_vm2, %v768_v20 }
 0x36e   : > { %773 = vst.msk [vmem:[%s340_s9 + $0x10] sm:$0xff] %vm611_vm2, %v769_v21  ;;  %774 = vst.msk [vmem:[%s340_s9 + $0x18] sm:$0xff] %vm611_vm2, %v770_v22  ;;  %v895_v44 = vrot.slane %v887_v23, %v1745_v50  ;;  %v902_v27 = vrot.slane %v888_v24, %v1745_v50  ;;  %v911_v28 = vrot.slane %v903_v25, %v1745_v50  ;;  %s1395_s9 = scalar_lea.vmem %s1394_s13, 1024 }
 0x36f   : > { %v918_v29 = vrot.slane %v904_v26, %v1745_v50  ;;  %p1397_p1 = scmp.lt.s32.totalorder %s1395_s9, %s1389_s11 }
 0x371   : > { %p1398_p2 = por %p1397_p1, %p1396_p9 }
 0x373   : > { %p1399_p7 = pnand %p1398_p2, %p1392_p5 }
 0x375   : > { %1402 = shalt.err (!%p1399_p7)
}
 0x376   : > { %s1403_s30 = scalar_lea.hbm %s1847_s8, 512  ;;  %s1407_s22 = scalar_lea.hbm %s1966_s6, 1024 }
 0x377   : > { %p1404_p3 = scmp.ne.s32.totalorder %s1847_s8, %s1403_s30  ;;  %p1408_p6 = scmp.lt.u32.totalorder %s1847_s8, %s1966_s6 }
 0x378   : > { %p1409_p8 = scmp.lt.u32.totalorder %s1407_s22, %s1403_s30  ;;  %p1411_p11 = scmp.lt.u32.totalorder %s1403_s30, %s1847_s8 }
 0x379   : > { %p1405_p4 = pnand %p1404_p3, %p1662_p10 }
 0x37a   : > { %p1410_p12 = por %p1409_p8, %p1408_p6 }
 0x37b   : > { %p1406_p13 = pneg %p1405_p4 }
 0x37c   : > { %p1412_p0 = por %p1411_p11, %p1410_p12 }
 0x37e   : > { %p1413_p5 = pnand %p1412_p0, %p1406_p13 }
 0x380   : > { %1416 = shalt.err (!%p1413_p5)
}
 0x381   : > { %1211 = dma.vmem_to_hbm [thread:$0]  (%p1662_p10), %s1849_s18, 512, %s1847_s8, %s1865_s27, %s1524_s19, %s1524_s19, %s1525_s17   ;;  %v919_v50 = vcombine.low %v895_v44, %v911_v28  ;;  %v920_v30 = vcombine.high %v895_v44, %v911_v28  ;;  %v921_v31 = vcombine.low %v902_v27, %v918_v29  ;;  %v922_v33 = vcombine.high %v902_v27, %v918_v29 }
 0x382   : > { %s1896_s30 = scalar_lea.hbm %s1967_s7, %s1763_s16  ;;  %s1417_s18 = scalar_lea.vmem %s1900_s3, 512 }
 0x383   : > { %923 = vst.msk [vmem:[%s1856_s12] sm:$0xff] %vm611_vm2, %v919_v50  ;;  %924 = vst.msk [vmem:[%s1856_s12 + $0x8] sm:$0xff] %vm611_vm2, %v920_v30  ;;  %p1418_p9 = scmp.ne.s32.totalorder %s1900_s3, %s1417_s18  ;;  %s1527_s16 = smov [#allocation10]  }
 0x384   : > { %925 = vst.msk [vmem:[%s1856_s12 + $0x10] sm:$0xff] %vm611_vm2, %v921_v31  ;;  %926 = vst.msk [vmem:[%s1856_s12 + $0x18] sm:$0xff] %vm611_vm2, %v922_v33  ;;  %s1421_s8 = sshll.u32 %s1527_s16, 4  ;;  %s1422_s8 = int_to_ptr.vmem [resolvable:$false] %s1421_s8 }
 0x385   : > { %p1419_p1 = pnand %p1418_p9, %p1662_p10  ;;  %s1423_s15 = scalar_lea.vmem %s1422_s8, 1024 }
 0x386   : > { %p1424_p7 = scmp.lt.s32.totalorder %s1900_s3, %s1422_s8  ;;  %p1425_p3 = scmp.lt.s32.totalorder %s1423_s15, %s1417_s18 }
 0x387   : > { %p1420_p2 = pneg %p1419_p1 }
 0x388   : > { %p1426_p4 = por %p1425_p3, %p1424_p7 }
 0x38a   : > { %p1427_p13 = pnand %p1426_p4, %p1420_p2 }
 0x38c   : > { %1430 = shalt.err (!%p1427_p13)
}
 0x38d   : > { %s1431_s12 = scalar_lea.hbm %s1896_s30, 512  ;;  %s1435_s20 = scalar_lea.hbm %s1967_s7, 1024 }
 0x38e   : > { %p1432_p6 = scmp.ne.s32.totalorder %s1896_s30, %s1431_s12  ;;  %p1436_p11 = scmp.lt.u32.totalorder %s1896_s30, %s1967_s7 }
 0x38f   : > { %p1437_p0 = scmp.lt.u32.totalorder %s1435_s20, %s1431_s12  ;;  %p1439_p9 = scmp.lt.u32.totalorder %s1431_s12, %s1896_s30 }
 0x390   : > { %p1433_p8 = pnand %p1432_p6, %p1662_p10 }
 0x391   : > { %p1438_p5 = por %p1437_p0, %p1436_p11 }
 0x392   : > { %p1434_p12 = pneg %p1433_p8 }
 0x393   : > { %p1440_p1 = por %p1439_p9, %p1438_p5 }
 0x395   : > { %p1441_p2 = pnand %p1440_p1, %p1434_p12 }
 0x397   : > { %1444 = shalt.err (!%p1441_p2)
}
 0x398   : > { %1212 = dma.vmem_to_hbm [thread:$0]  (%p1662_p10), %s1900_s3, 512, %s1896_s30, %s1865_s27, %s1524_s19, %s1524_s19, %s1525_s17  }
 0x399 PF: > { %s1001_s9 = sand.u32 1, %s1487_s24   ;;  %p1988_p7 = scmp.ne.s32.totalorder %s1975_s10, 0 }
 0x39a   : > { %p1989_p3 = scmp.ge.s32.totalorder %s1507_s29, 2  ;;  %s1002_s18 = scalar_lea.sflag [#allocation4], %s1001_s9 }
 0x39c   : > { %p1225_p4 = pnand %p1989_p3, %p1988_p7 }
 0x39e   : > { %1478 = dma.done.wait (!%p1225_p4), %s1002_s18, 512  }
 0x39f   : > { %1480 = vsyncadd (!%p1225_p4), %s1002_s18, 4294966784  ;;  %s1990_s21 = sadd.s32 4294967294, %s1507_s29  }
 0x3a0   : > { %s1010_s16 = sand.u32 1, %s1990_s21  }
 0x3a1   : > { %s1011_s8 = scalar_lea.sflag [#allocation9], %s1010_s16 }
 0x3a2   : > { %1482 = dma.done.wait (!%p1225_p4), %s1011_s8, 1024  }
 0x3a3   : > { %1484 = vsyncadd (!%p1225_p4), %s1011_s8, 4294966272  ;;  %s28_s29 = sadd.s32 1, %s1507_s29   ;;  %s1991_s19 = sld [smem:[#allocation15_spill]] }
 0x3a4   : > { %p25_p10 = scmp.ge.s32.totalorder %s28_s29, 4   ;;  %s1992_s24 = smov %s1491_s25 }
 0x3a5   : > { %s1993_s25 = smov %s1495_s26  ;;  %s1994_s26 = smov %s1671_s23 }
 0x3a6   : > { %s1995_s27 = smov %s1503_s28  ;;  %27 = sbr.rel (!%p25_p10) target bundleno = 11 (0xb), region = 121 }
 0x3a9   : > { %s1996_s28 = smov %s1991_s19 }
 0x3ad   :  { %1025 = vsyncpa [#allocation3], 1 }
 0x3ae   :  { %1027 = vsyncpa [#allocation3 + $0x1], 1 }
 0x3af   :  { %1028 = vsyncpa [#allocation6], 1 }
 0x3b0   :  { %1029 = vsyncpa [#allocation4], 1 }
 0x3b1   :  { %1031 = vsyncpa [#allocation4 + $0x1], 1 }
 0x3b2   :  { %1032 = vsyncpa [#allocation9], 1 }
 0x3b3   :  { %1034 = vsyncpa [#allocation9 + $0x1], 1 }

// kernel: tpu_custom_call.1
= control target key start
LH: loop header
LB: loop body
LE: loop exit
PB: predicated region body
PF: predicated region fallthrough
CT: control target
= control target key end

     0   :  { %s1960_s0 = inlined_call_operand.hbm [shape: f32[2,8,32], index: 0, kind: input, shape index: {}]   ;;  %s1961_s1 = inlined_call_operand.vmem [shape: f32[1,32], index: 1, kind: input, shape index: {}]   ;;  %s1962_s2 = inlined_call_operand.vmem [shape: f32[1,32], index: 2, kind: input, shape index: {}]   ;;  %s1963_s3 = inlined_call_operand.hbm [shape: f32[32,96], index: 3, kind: input, shape index: {}]   ;;  %s1964_s4 = inlined_call_operand.vmem [shape: f32[1,96], index: 4, kind: input, shape index: {}]   ;;  %s1965_s5 = inlined_call_operand.hbm [shape: f32[2,4,8,8], index: 5, kind: output, shape index: {0}]   ;;  %s1966_s6 = inlined_call_operand.hbm [shape: f32[2,4,8,8], index: 6, kind: output, shape index: {1}]   ;;  %s1967_s7 = inlined_call_operand.hbm [shape: f32[2,4,8,8], index: 7, kind: output, shape index: {2}]  }
   0x1   :  { %1973 = sst [smem:[#allocation16_spill]] %s1963_s3 }
   0x2   :  { %13 = vsyncpa [#allocation3], 0 }
   0x3   :  { %15 = vsyncpa [#allocation3 + $0x1], 0 }
   0x4   :  { %16 = vsyncpa [#allocation6], 0 }
   0x5   :  { %17 = vsyncpa [#allocation4], 0 }
   0x6   :  { %19 = vsyncpa [#allocation4 + $0x1], 0 }
   0x7   :  { %20 = vsyncpa [#allocation9], 0 }
   0x8   :  { %22 = vsyncpa [#allocation9 + $0x1], 0  ;;  %s1568_s24 = smov 0   ;;  %s1570_s25 = smov 0  }
   0x9   :  { %s1572_s26 = smov 0   ;;  %s1574_s27 = smov 0  }
   0xa   :  { %s1576_s28 = smov 0   ;;  %s1578_s29 = smov 0  }
   0xb LB: > { %s1599_s30 = sadd.s32 4294967295, %s1507_s29   ;;  %s1971_s8 = sadd.s32 4294967294, %s1507_s29   ;;  %s1507_s29 = sphi %s1578_s29, %s28_s29   ;;  %s1503_s28 = sphi %s1576_s28, %s1996_s28   ;;  %s1499_s27 = sphi %s1574_s27, %s1995_s27   ;;  %s1495_s26 = sphi %s1572_s26, %s1994_s26   ;;  %s1491_s25 = sphi %s1570_s25, %s1993_s25   ;;  %s1487_s24 = sphi %s1568_s24, %s1992_s24  }
   0xc   : > { %p62_p0 = scmp.ne.s32.totalorder %s1491_s25, %s1487_s24  ;;  %p1968_p1 = scmp.eq.s32.totalorder %s1599_s30, 0 }
   0xd   : > { %p178_p3 = scmp.eq.s32.totalorder %s1971_s8, 1  ;;  %p1147_p5 = scmp.ge.s32.totalorder %s1507_s29, 1 }
   0xe   : > { %p1610_p4 = por %p1968_p1, %p62_p0  ;;  %p241_p7 = scmp.lt.s32.totalorder %s1507_s29, 3 }
   0xf   : > { %p1615_p6 = por %p178_p3, %p62_p0  ;;  %s1509_s12 = smov [#allocation5]  }
  0x10   : > { %s1974_s9 = scalar_select %p1610_p4, 1, 0 }
  0x11   : > { %s1975_s10 = scalar_select %p1615_p6, 1, 0 }
  0x12   : > { %p1620_p8 = pnand %p1147_p5, %p241_p7  ;;  %s259_s13 = sshll.u32 %s1509_s12, 4  ;;  %s260_s13 = int_to_ptr.vmem [resolvable:$true] %s259_s13 }
  0x13   : > { %s40_s15 = sadd.s32 1, %s1503_s28  ;;  %s1978_s3 = sld [smem:[#allocation16_spill]] }
  0x14   : > { %s1976_s11 = scalar_select %p1620_p8, 1, 0 }
  0x15   : > { %p1216_p9 = pneg %p1620_p8 }
  0x17   : > { %p1629_p11 = pnand %p1216_p9, %p1968_p1 }
  0x19   : > { %s1303_s18 = scalar_lea.hbm %s1978_s3, 512  ;;  %p1305_p13 = pneg %p1629_p11 }
  0x1a   : > { %p1304_p12 = scmp.ne.s32.totalorder %s1978_s3, %s1303_s18  ;;  %p1310_p5 = scmp.lt.u32.totalorder %s1303_s18, %s1978_s3 }
  0x1c   : > { %p1306_p0 = pnand %p1305_p13, %p1304_p12 }
  0x1e   : > { %p1307_p3 = pneg %p1306_p0 }
  0x20   : > { %p1312_p7 = pnand %p1310_p5, %p1307_p3 }
  0x22   : > { %1315 = shalt.err (!%p1312_p7)
}
  0x23   : > { %s1316_s23 = scalar_lea.vmem %s260_s13, 512  ;;  %p1324_p2 = scmp.lt.s32.totalorder %s260_s13, %s260_s13 }
  0x24   : > { %p1317_p9 = scmp.ne.s32.totalorder %s260_s13, %s1316_s23  ;;  %p1325_p6 = scmp.lt.s32.totalorder %s1316_s23, %s1316_s23 }
  0x26   : > { %p1319_p10 = pnand %p1317_p9, %p1305_p13  ;;  %p1326_p4 = por %p1325_p6, %p1324_p2 }
  0x28   : > { %p1320_p1 = pneg %p1319_p10 }
  0x2a   : > { %p1327_p8 = pnand %p1326_p4, %p1320_p1 }
  0x2c   : > { %1330 = shalt.err (!%p1327_p8)
}
  0x2d   : > { %s1510_s12 = smov 128   ;;  %s1511_s16 = smov 8  }
  0x2e   : > { %1219 = dma.hbm_to_vmem [thread:$0]  (!%p1629_p11), %s1978_s3, 512, %s260_s13, [#allocation6], %s1510_s12, %s1510_s12, %s1511_s16  }
  0x2f   : > { %p42_p1 = scmp.ge.s32.totalorder %s40_s15, 2  ;;  %s49_s19 = sadd.s32 1, %s1495_s26 }
  0x30   : > { %p56_p2 = scmp.ne.s32.totalorder %s1495_s26, %s1491_s25  ;;  %p57_p4 = scmp.eq.s32.totalorder %s1507_s29, 0 }
  0x31   : > { %s1998_s15 = smov (%p42_p1, %s40_s15), 0  ;;  %p1981_p8 = scmp.eq.s32.totalorder %s1599_s30, 1 }
  0x32   : > { %1979 = sst [smem:[#allocation15_spill]] %s1998_s15  ;;  %p1656_p6 = por %p57_p4, %p56_p2 }
  0x33   : > { %p1662_p10 = por %p1981_p8, %p56_p2  ;;  %s44_s14 = ssub.s32 %s1503_s28, %s1998_s15 }
  0x34   : > { %p1235_p12 = scmp.lt.s32.totalorder %s1507_s29, 2  ;;  %p47_p11 = scmp.eq.s32.totalorder %s44_s14, 0 }
  0x35   : > { %s276_s13 = sand.u32 1, %s1495_s26   ;;  %s1151_s12 = sshll.u32 %s1503_s28, 7 }
  0x36   : > { %s1150_s22 = sshll.u32 %s276_s13, 3  ;;  %s1677_s18 = scalar_lea.hbm %s1960_s0, %s1151_s12 }
  0x37   : > { %s1671_s23 = scalar_select %p47_p11, %s1495_s26, %s49_s19  }
  0x38   : > { %s280_s8 = scalar_lea.vmem [#allocation2], %s1150_s22  ;;  %p1683_p13 = pnand %p1235_p12, %p1656_p6 }
  0x39   : > { %s288_s3 = sshll.u32 %s280_s8, 4  ;;  %s277_s19 = scalar_lea.sflag [#allocation3], %s276_s13  ;;  %s1679_s3 = int_to_ptr.vmem [resolvable:$true] %s288_s3 }
  0x3a   : > { %s1331_s15 = scalar_lea.hbm %s1677_s18, 128  ;;  %p1333_p3 = pneg %p1683_p13 }
  0x3b   : > { %p1332_p0 = scmp.ne.s32.totalorder %s1677_s18, %s1331_s15  ;;  %s1336_s12 = scalar_lea.hbm %s1960_s0, 256 }
  0x3c   : > { %p1337_p9 = scmp.lt.u32.totalorder %s1677_s18, %s1960_s0  ;;  %p1338_p1 = scmp.lt.u32.totalorder %s1336_s12, %s1331_s15 }
  0x3d   : > { %p1334_p5 = pnand %p1333_p3, %p1332_p0  ;;  %p1340_p4 = scmp.lt.u32.totalorder %s1331_s15, %s1677_s18 }
  0x3e   : > { %p1339_p2 = por %p1338_p1, %p1337_p9 }
  0x3f   : > { %p1335_p7 = pneg %p1334_p5 }
  0x40   : > { %p1341_p6 = por %p1340_p4, %p1339_p2 }
  0x42   : > { %p1342_p8 = pnand %p1341_p6, %p1335_p7 }
  0x44   : > { %1345 = shalt.err (!%p1342_p8)
}
  0x45   : > { %s1346_s13 = scalar_lea.vmem %s1679_s3, 128  ;;  %s1512_s17 = smov [#allocation2]  }
  0x46   : > { %p1347_p12 = scmp.ne.s32.totalorder %s1679_s3, %s1346_s13  ;;  %s1351_s22 = sshll.u32 %s1512_s17, 4  ;;  %s1352_s22 = int_to_ptr.vmem [resolvable:$false] %s1351_s22 }
  0x47   : > { %s1353_s8 = scalar_lea.vmem %s1352_s22, 256  ;;  %p1354_p5 = scmp.lt.s32.totalorder %s1679_s3, %s1352_s22 }
  0x48   : > { %p1349_p11 = pnand %p1347_p12, %p1333_p3  ;;  %p1355_p9 = scmp.lt.s32.totalorder %s1353_s8, %s1346_s13 }
  0x4a   : > { %p1350_p0 = pneg %p1349_p11  ;;  %p1356_p1 = por %p1355_p9, %p1354_p5 }
  0x4c   : > { %p1357_p2 = pnand %p1356_p1, %p1350_p0 }
  0x4e   : > { %1360 = shalt.err (!%p1357_p2)
}
  0x4f   : > { %1223 = dma.hbm_to_vmem [thread:$0]  (!%p1683_p13), %s1677_s18, 128, %s1679_s3, %s277_s19  }
  0x50   : > { %p1984_p7 = scmp.ne.s32.totalorder %s1976_s11, 0 }
  0x51   : > { %s1715_s15 = sand.u32 (!%p1984_p7), 1, %s1491_s25   ;;  %p1985_p3 = scmp.ne.s32.totalorder (!%p1984_p7), %s1974_s9, 0 }
  0x52   : > { %297 = sbr.rel (%p1984_p7) target bundleno = 921 (0x399), region = 40  ;;  %s1153_s12 = sshll.u32 (!%p1984_p7), %s1715_s15, 3 }
  0x53   : > { %s300_s20 = scalar_lea.sflag (!%p1984_p7), [#allocation3], %s1715_s15  ;;  %s303_s16 = scalar_lea.vmem (!%p1984_p7), [#allocation2], %s1153_s12 }
  0x59   : > { %1470 = dma.done.wait (%p1985_p3), %s300_s20, 128  }
  0x5a   : > { %1472 = vsyncadd (%p1985_p3), %s300_s20, 4294967168  ;;  %p1986_p4 = scmp.eq.s32.totalorder %s1599_s30, 0 }
  0x5c   : > { %1474 = dma.done.wait (%p1986_p4), [#allocation6], 512   ;;  %p1987_p13 = pmov %p1986_p4 }
  0x5d   : > { %vm351_vm0 = vcmask 261120   ;;  %v348_v0 = vld [vmem:[%s303_s16] sm:$0xff]  ;;  %v380_v7 = vld [vmem:[#allocation5] sm:$0xff]  ;;  %v381_v8 = vld [vmem:[#allocation5 + $0x8] sm:$0xff]  ;;  %v1513_v10 = vmov 0.0|0.0   ;;  %vm1514_vm1 = vmmov 0   ;;  %v480_v35 = vlaneseq }
  0x5e   : > { %1476 = vsyncadd (%p1987_p13), [#allocation6], 4294966784  ;;  %v352_v1 = vsel %vm351_vm0, %v348_v0, 0.0  ;;  %v382_v9 = vld [vmem:[#allocation5 + $0x10] sm:$0xff]  ;;  %1198 = vmatprep.subr.bf16.mxu0 %v1513_v10  ;;  %v1199_v11 = vpack.c.bf16 %v381_v8, %v380_v7  ;;  %v383_v12 = vld [vmem:[#allocation5 + $0x18] sm:$0xff]  ;;  %v1515_v13 = vmov 0.0  }
  0x5f   : > { %353 = vadd.xlane.f32.xlu0 %v352_v1  ;;  %1195 = vmatprep.mubr.msk.f32.mxu0 %vm1514_vm1, %v1515_v13  ;;  %v1202_v14 = vpack.c.bf16 %v383_v12, %v382_v9  ;;  %v1158_v19 = vld [vmem:[%s1961_s1] ss:$0 sm:$0xff]  ;;  %s1516_s13 = smov 104   ;;  %s1517_s17 = smov 120   ;;  %v1521_v33 = vmov 1983009808  }
  0x60   : > { %1200 = vmatpush3.bf16.msra.mxu0 %v1199_v11  ;;  %v1159_v21 = vld [vmem:[%s1962_s2] ss:$0 sm:$0xff]  ;;  %s1518_s22 = smov 112   ;;  %s1519_s8 = smov 96   ;;  %v478_v34 = vunpack.c.l.s4 %v1521_v33  ;;  %v1522_v37 = vmov 1934713408  }
  0x61   : > { %1201 = vmatprep.subr.bf16.mxu0 %v1513_v10  ;;  %v1160_v24 = vld [vmem:[%s1964_s4] ss:$0 sm:$0xff]  ;;  %s1520_s12 = smov 64   ;;  %v510_v38 = vunpack.c.l.s4 %v1522_v37  ;;  %v481_v40 = vshrl.u32 %v480_v35, 7  ;;  %s1756_s20 = sshll.u32 %s1715_s15, 5  ;;  %vm611_vm2 = vcmask 64512  }
  0x62   : > { %v479_v39 = vunpack.c.0.s8 %v478_v34  ;;  %s1763_s16 = sshll.u32 %s1499_s27, 9  ;;  %s333_s3 = scalar_lea.vmem [#allocation7], %s1756_s20 }
  0x63   : > { %v511_v43 = vunpack.c.0.s8 %v510_v38  ;;  %s952_s9 = sshll.u32 %s333_s3, 4  ;;  %s1774_s18 = scalar_lea.hbm %s1965_s5, %s1763_s16  ;;  %s1776_s9 = int_to_ptr.vmem [resolvable:$true] %s952_s9 }
  0x64   : > { %1203 = vmatpush3.bf16.msra.mxu0 %v1202_v14  ;;  %v1743_v44 = vsub.s32 %v479_v39, %v481_v40  ;;  %s928_s14 = scalar_lea.sflag [#allocation4], %s1715_s15  ;;  %s1361_s19 = scalar_lea.vmem %s1776_s9, 512 }
  0x65   : > { %v1745_v50 = vsub.s32 %v511_v43, %v481_v40  ;;  %p1362_p6 = scmp.ne.s32.totalorder %s1776_s9, %s1361_s19 }
  0x67   : > { %p1363_p8 = pnand %p1362_p6, %p1662_p10 }
  0x69   : > { %p1364_p12 = pneg %p1363_p8 }
  0xec   : > { %v354_v2 = vpop.xlane.xlu0 %353 }
  0xed   : > { %v356_v3 = vmul.f32 0.03125, %v354_v2 }
  0xef   : > { %v357_v4 = vsub.f32 %v348_v0, %v356_v3 }
  0xf1   : > { %v358_v5 = vmul.f32 %v357_v4, %v357_v4 }
  0xf3   : > { %v359_v6 = vsel %vm351_vm0, %v358_v5, 0.0 }
  0xf4   : > { %360 = vadd.xlane.f32.xlu0 %v359_v6 }
 0x181   : > { %v361_v15 = vpop.xlane.xlu0 %360 }
 0x182   : > { %v362_v16 = vmul.f32 0.03125, %v361_v15 }
 0x184   : > { %v363_v17 = vadd.f32 1e-05, %v362_v16 }
 0x186   : > { %1301 = vrsqrt.f32 %v363_v17 }
 0x190   : > { %v1302_v18 = vpop.eup %1301 }
 0x191   : > { %v365_v20 = vmul.f32 %v1302_v18, %v357_v4 }
 0x193   : > { %v372_v22 = vmul.f32 %v1158_v19, %v365_v20 }
 0x195   : > { %v379_v23 = vadd.f32 %v1159_v21, %v372_v22 }
 0x197   : > { %1196 = vmatmul.mubr.msk.f32.vlgmr.msra.gmra.mrb[0].mxu0 %vm351_vm0, %v379_v23 }
 0x26a   : > { %v460_v25 = vpop.f32.mrb[0].mxu0 }
 0x26b   : > { %v461_v26 = vadd.f32 %v1160_v24, %v460_v25  ;;  %v1197_v27 = vpop.f32.mrb[1].mxu0 }
 0x26d   : > { %621 = vrot.lane.b32.xlu0 %v461_v26, %s1516_s13  ;;  %617 = vrot.lane.b32.xlu1 %v461_v26, %s1517_s17  ;;  %v464_v28 = vmul.f32 0.35355338, %v461_v26 }
 0x271   : > { %619 = vrot.lane.b32.xlu1 %v461_v26, %s1518_s22  ;;  %472 = vrot.lane.b32.xlu0 %v464_v28, %s1516_s13  ;;  %s1523_s13 = smov [#allocation7]  }
 0x275   : > { %623 = vrot.lane.b32.xlu1 %v461_v26, %s1519_s8 }
 0x279   : > { %775 = vrot.lane.b32.xlu1 %v461_v26, %s1520_s12 }
 0x27d   : > { %466 = vrot.lane.b32.xlu1 %v464_v28, %s1517_s17  ;;  %s1365_s17 = sshll.u32 %s1523_s13, 4  ;;  %s1366_s17 = int_to_ptr.vmem [resolvable:$false] %s1365_s17 }
 0x27e   : > { %p1368_p11 = scmp.lt.s32.totalorder %s1776_s9, %s1366_s17 }
 0x281   : > { %469 = vrot.lane.b32.xlu1 %v464_v28, %s1518_s22  ;;  %s1367_s22 = scalar_lea.vmem %s1366_s17, 1024 }
 0x282   : > { %p1369_p0 = scmp.lt.s32.totalorder %s1367_s22, %s1361_s19 }
 0x284   : > { %p1370_p5 = por %p1369_p0, %p1368_p11 }
 0x286   : > { %p1371_p9 = pnand %p1370_p5, %p1364_p12 }
 0x2df   : > { %v618_v29 = vpop.permute.xlu1 %617  ;;  %v622_v30 = vpop.permute.xlu0 %621 }
 0x2e0   : > { %777 = vrot.lane.b32.xlu0 %v618_v29, %s1520_s12  ;;  %625 = vrot.lane.b32.xlu1 %v618_v29, %s1519_s8 }
 0x2e3   : > { %v620_v31 = vpop.permute.xlu1 %619  ;;  %v473_v42 = vpop.permute.xlu0 %472 }
 0x2e4   : > { %781 = vrot.lane.b32.xlu0 %v622_v30, %s1520_s12  ;;  %627 = vrot.lane.b32.xlu1 %v620_v31, %s1519_s8 }
 0x2e7   : > { %v1739_v32 = vpop.permute.xlu1 %623 }
 0x2e8   : > { %629 = vrot.lane.b32.xlu1 %v622_v30, %s1519_s8 }
 0x2eb   : > { %v1741_v36 = vpop.permute.xlu1 %775 }
 0x2ec   : > { %779 = vrot.lane.b32.xlu1 %v620_v31, %s1520_s12 }
 0x2ef   : > { %v467_v41 = vpop.permute.xlu1 %466 }
 0x2f0   : > { %v491_v45 = vcombine.low %v467_v41, %v473_v42  ;;  %v492_v46 = vcombine.high %v467_v41, %v473_v42 }
 0x2f2   : > { %v499_v51 = vrot.slane %v491_v45, %v1743_v44  ;;  %v506_v52 = vrot.slane %v492_v46, %v1743_v44 }
 0x2f3   : > { %v470_v47 = vpop.permute.xlu1 %469 }
 0x2f4   : > { %v475_v48 = vcombine.low %v464_v28, %v470_v47  ;;  %v476_v49 = vcombine.high %v464_v28, %v470_v47 }
 0x2f6   : > { %v483_v53 = vrot.slane %v475_v48, %v1743_v44  ;;  %v490_v54 = vrot.slane %v476_v49, %v1743_v44 }
 0x2f8   : > { %v507_v55 = vcombine.low %v483_v53, %v499_v51  ;;  %v508_v56 = vcombine.high %v483_v53, %v499_v51  ;;  %v523_v57 = vcombine.low %v490_v54, %v506_v52  ;;  %v524_v58 = vcombine.high %v490_v54, %v506_v52 }
 0x2fa   : > { %v515_v59 = vrot.slane %v507_v55, %v1745_v50  ;;  %v522_v60 = vrot.slane %v508_v56, %v1745_v50  ;;  %v531_v61 = vrot.slane %v523_v57, %v1745_v50  ;;  %v538_v62 = vrot.slane %v524_v58, %v1745_v50 }
 0x2fc   : > { %v543_v63 = vcombine.low %v515_v59, %v522_v60  ;;  %v1162_v0 = vcombine.high %v515_v59, %v522_v60  ;;  %v559_v1 = vcombine.low %v531_v61, %v538_v62  ;;  %v1163_v2 = vcombine.high %v531_v61, %v538_v62 }
 0x2fe   : > { %v550_v3 = vrot.slane %v543_v63, %v1743_v44  ;;  %v558_v4 = vrot.slane %v1162_v0, %v1743_v44  ;;  %v566_v5 = vrot.slane %v559_v1, %v1743_v44  ;;  %v574_v6 = vrot.slane %v1163_v2, %v1743_v44 }
 0x300   : > { %v575_v7 = vcombine.low %v550_v3, %v558_v4  ;;  %v576_v8 = vcombine.high %v550_v3, %v558_v4  ;;  %v591_v9 = vcombine.low %v566_v5, %v574_v6  ;;  %v592_v10 = vcombine.high %v566_v5, %v574_v6 }
 0x302   : > { %v583_v11 = vrot.slane %v575_v7, %v1745_v50  ;;  %v590_v12 = vrot.slane %v576_v8, %v1745_v50  ;;  %v599_v13 = vrot.slane %v591_v9, %v1745_v50  ;;  %v606_v14 = vrot.slane %v592_v10, %v1745_v50 }
 0x304   : > { %v607_v15 = vcombine.low %v583_v11, %v599_v13  ;;  %v608_v16 = vcombine.high %v583_v11, %v599_v13  ;;  %v609_v17 = vcombine.low %v590_v12, %v606_v14  ;;  %v610_v18 = vcombine.high %v590_v12, %v606_v14 }
 0x306   : > { %612 = vst.msk [vmem:[%s333_s3] sm:$0xff] %vm611_vm2, %v607_v15  ;;  %613 = vst.msk [vmem:[%s333_s3 + $0x8] sm:$0xff] %vm611_vm2, %v608_v16 }
 0x307   : > { %614 = vst.msk [vmem:[%s333_s3 + $0x10] sm:$0xff] %vm611_vm2, %v609_v17  ;;  %615 = vst.msk [vmem:[%s333_s3 + $0x18] sm:$0xff] %vm611_vm2, %v610_v18 }
 0x308   : > { %1374 = shalt.err (!%p1371_p9)
}
 0x309   : > { %s1375_s8 = scalar_lea.hbm %s1774_s18, 512  ;;  %s1379_s27 = scalar_lea.hbm %s1965_s5, 1024 }
 0x30a   : > { %p1376_p1 = scmp.ne.s32.totalorder %s1774_s18, %s1375_s8  ;;  %p1380_p3 = scmp.lt.u32.totalorder %s1774_s18, %s1965_s5 }
 0x30b   : > { %p1381_p4 = scmp.lt.u32.totalorder %s1379_s27, %s1375_s8  ;;  %p1383_p6 = scmp.lt.u32.totalorder %s1375_s8, %s1774_s18 }
 0x30c   : > { %p1377_p2 = pnand %p1376_p1, %p1662_p10 }
 0x30d   : > { %p1382_p13 = por %p1381_p4, %p1380_p3 }
 0x30e   : > { %p1378_p7 = pneg %p1377_p2 }
 0x30f   : > { %p1384_p8 = por %p1383_p6, %p1382_p13 }
 0x311   : > { %p1385_p12 = pnand %p1384_p8, %p1378_p7 }
 0x313   : > { %1388 = shalt.err (!%p1385_p12)
}
 0x314   : > { %s1524_s19 = smov 128   ;;  %s1525_s17 = smov 8  }
 0x315   : > { %1210 = dma.vmem_to_hbm [thread:$0]  (%p1662_p10), %s1776_s9, 512, %s1774_s18, %s928_s14, %s1524_s19, %s1524_s19, %s1525_s17  }
 0x316   : > { %s932_s15 = sand.u32 1, %s1599_s30   ;;  %s340_s9 = scalar_lea.vmem [#allocation8], %s1756_s20 }
 0x317   : > { %s969_s18 = sshll.u32 %s340_s9, 4  ;;  %s1847_s8 = scalar_lea.hbm %s1966_s6, %s1763_s16  ;;  %s1849_s18 = int_to_ptr.vmem [resolvable:$true] %s969_s18 }
 0x318   : > { %s1856_s12 = scalar_lea.vmem [#allocation10], %s1756_s20  ;;  %s1865_s27 = scalar_lea.sflag [#allocation9], %s932_s15 }
 0x319   : > { %s986_s3 = sshll.u32 %s1856_s12, 4  ;;  %s1389_s11 = scalar_lea.vmem %s1849_s18, 512  ;;  %s1900_s3 = int_to_ptr.vmem [resolvable:$true] %s986_s3 }
 0x31a   : > { %p1390_p11 = scmp.ne.s32.totalorder %s1849_s18, %s1389_s11  ;;  %s1526_s20 = smov [#allocation8]  }
 0x31b   : > { %s1393_s13 = sshll.u32 %s1526_s20, 4  ;;  %s1394_s13 = int_to_ptr.vmem [resolvable:$false] %s1393_s13 }
 0x31c   : > { %p1391_p0 = pnand %p1390_p11, %p1662_p10  ;;  %p1396_p9 = scmp.lt.s32.totalorder %s1849_s18, %s1394_s13 }
 0x31e   : > { %p1392_p5 = pneg %p1391_p0 }
 0x352   : > { %v626_v19 = vpop.permute.xlu1 %625  ;;  %v778_v20 = vpop.permute.xlu0 %777 }
 0x356   : > { %v628_v21 = vpop.permute.xlu1 %627  ;;  %v782_v25 = vpop.permute.xlu0 %781 }
 0x357   : > { %v635_v22 = vcombine.low %v1739_v32, %v628_v21  ;;  %v636_v23 = vcombine.high %v1739_v32, %v628_v21  ;;  %v803_v33 = vcombine.low %v778_v20, %v782_v25  ;;  %v804_v34 = vcombine.high %v778_v20, %v782_v25 }
 0x359   : > { %v643_v28 = vrot.slane %v635_v22, %v1743_v44  ;;  %v650_v29 = vrot.slane %v636_v23, %v1743_v44  ;;  %v811_v47 = vrot.slane %v803_v33, %v1743_v44  ;;  %v818_v48 = vrot.slane %v804_v34, %v1743_v44 }
 0x35a   : > { %v630_v24 = vpop.permute.xlu1 %629 }
 0x35b   : > { %v651_v26 = vcombine.low %v626_v19, %v630_v24  ;;  %v652_v27 = vcombine.high %v626_v19, %v630_v24 }
 0x35d   : > { %v659_v30 = vrot.slane %v651_v26, %v1743_v44  ;;  %v666_v31 = vrot.slane %v652_v27, %v1743_v44 }
 0x35e   : > { %v780_v35 = vpop.permute.xlu1 %779 }
 0x35f   : > { %v667_v37 = vcombine.low %v643_v28, %v659_v30  ;;  %v668_v38 = vcombine.high %v643_v28, %v659_v30  ;;  %v683_v39 = vcombine.low %v650_v29, %v666_v31  ;;  %v684_v40 = vcombine.high %v650_v29, %v666_v31 }
 0x360   : > { %v787_v32 = vcombine.low %v1741_v36, %v780_v35  ;;  %v788_v41 = vcombine.high %v1741_v36, %v780_v35 }
 0x361   : > { %v675_v42 = vrot.slane %v667_v37, %v1745_v50  ;;  %v682_v43 = vrot.slane %v668_v38, %v1745_v50  ;;  %v691_v45 = vrot.slane %v683_v39, %v1745_v50  ;;  %v698_v46 = vrot.slane %v684_v40, %v1745_v50 }
 0x362   : > { %v795_v49 = vrot.slane %v787_v32, %v1743_v44  ;;  %v802_v51 = vrot.slane %v788_v41, %v1743_v44 }
 0x363   : > { %v703_v52 = vcombine.low %v675_v42, %v682_v43  ;;  %v1164_v53 = vcombine.high %v675_v42, %v682_v43  ;;  %v719_v54 = vcombine.low %v691_v45, %v698_v46  ;;  %v1165_v36 = vcombine.high %v691_v45, %v698_v46 }
 0x364   : > { %v819_v55 = vcombine.low %v795_v49, %v811_v47  ;;  %v820_v56 = vcombine.high %v795_v49, %v811_v47  ;;  %v835_v57 = vcombine.low %v802_v51, %v818_v48  ;;  %v836_v58 = vcombine.high %v802_v51, %v818_v48 }
 0x365   : > { %v710_v59 = vrot.slane %v703_v52, %v1743_v44  ;;  %v718_v60 = vrot.slane %v1164_v53, %v1743_v44  ;;  %v726_v61 = vrot.slane %v719_v54, %v1743_v44  ;;  %v734_v62 = vrot.slane %v1165_v36, %v1743_v44 }
 0x366   : > { %v827_v63 = vrot.slane %v819_v55, %v1745_v50  ;;  %v834_v0 = vrot.slane %v820_v56, %v1745_v50  ;;  %v843_v1 = vrot.slane %v835_v57, %v1745_v50  ;;  %v850_v2 = vrot.slane %v836_v58, %v1745_v50 }
 0x367   : > { %v735_v3 = vcombine.low %v710_v59, %v718_v60  ;;  %v736_v4 = vcombine.high %v710_v59, %v718_v60  ;;  %v751_v5 = vcombine.low %v726_v61, %v734_v62  ;;  %v752_v6 = vcombine.high %v726_v61, %v734_v62 }
 0x368   : > { %v855_v7 = vcombine.low %v827_v63, %v834_v0  ;;  %v1166_v8 = vcombine.high %v827_v63, %v834_v0  ;;  %v871_v9 = vcombine.low %v843_v1, %v850_v2  ;;  %v1167_v10 = vcombine.high %v843_v1, %v850_v2 }
 0x369   : > { %v743_v11 = vrot.slane %v735_v3, %v1745_v50  ;;  %v750_v12 = vrot.slane %v736_v4, %v1745_v50  ;;  %v759_v13 = vrot.slane %v751_v5, %v1745_v50  ;;  %v766_v14 = vrot.slane %v752_v6, %v1745_v50 }
 0x36a   : > { %v862_v15 = vrot.slane %v855_v7, %v1743_v44  ;;  %v870_v16 = vrot.slane %v1166_v8, %v1743_v44  ;;  %v878_v17 = vrot.slane %v871_v9, %v1743_v44  ;;  %v886_v18 = vrot.slane %v1167_v10, %v1743_v44 }
 0x36b   : > { %v767_v19 = vcombine.low %v743_v11, %v759_v13  ;;  %v768_v20 = vcombine.high %v743_v11, %v759_v13  ;;  %v769_v21 = vcombine.low %v750_v12, %v766_v14  ;;  %v770_v22 = vcombine.high %v750_v12, %v766_v14 }
 0x36c   : > { %v887_v23 = vcombine.low %v862_v15, %v870_v16  ;;  %v888_v24 = vcombine.high %v862_v15, %v870_v16  ;;  %v903_v25 = vcombine.low %v878_v17, %v886_v18  ;;  %v904_v26 = vcombine.high %v878_v17, %v886_v18 }
 0x36d   : > { %771 = vst.msk [vmem:[%s340_s9] sm:$0xff] %vm611_vm2, %v767_v19  ;;  %772 = vst.msk [vmem:[%s340_s9 + $0x8] sm:$0xff] %vm611_vm2, %v768_v20 }
 0x36e   : > { %773 = vst.msk [vmem:[%s340_s9 + $0x10] sm:$0xff] %vm611_vm2, %v769_v21  ;;  %774 = vst.msk [vmem:[%s340_s9 + $0x18] sm:$0xff] %vm611_vm2, %v770_v22  ;;  %v895_v44 = vrot.slane %v887_v23, %v1745_v50  ;;  %v902_v27 = vrot.slane %v888_v24, %v1745_v50  ;;  %v911_v28 = vrot.slane %v903_v25, %v1745_v50  ;;  %s1395_s9 = scalar_lea.vmem %s1394_s13, 1024 }
 0x36f   : > { %v918_v29 = vrot.slane %v904_v26, %v1745_v50  ;;  %p1397_p1 = scmp.lt.s32.totalorder %s1395_s9, %s1389_s11 }
 0x371   : > { %p1398_p2 = por %p1397_p1, %p1396_p9 }
 0x373   : > { %p1399_p7 = pnand %p1398_p2, %p1392_p5 }
 0x375   : > { %1402 = shalt.err (!%p1399_p7)
}
 0x376   : > { %s1403_s30 = scalar_lea.hbm %s1847_s8, 512  ;;  %s1407_s22 = scalar_lea.hbm %s1966_s6, 1024 }
 0x377   : > { %p1404_p3 = scmp.ne.s32.totalorder %s1847_s8, %s1403_s30  ;;  %p1408_p6 = scmp.lt.u32.totalorder %s1847_s8, %s1966_s6 }
 0x378   : > { %p1409_p8 = scmp.lt.u32.totalorder %s1407_s22, %s1403_s30  ;;  %p1411_p11 = scmp.lt.u32.totalorder %s1403_s30, %s1847_s8 }
 0x379   : > { %p1405_p4 = pnand %p1404_p3, %p1662_p10 }
 0x37a   : > { %p1410_p12 = por %p1409_p8, %p1408_p6 }
 0x37b   : > { %p1406_p13 = pneg %p1405_p4 }
 0x37c   : > { %p1412_p0 = por %p1411_p11, %p1410_p12 }
 0x37e   : > { %p1413_p5 = pnand %p1412_p0, %p1406_p13 }
 0x380   : > { %1416 = shalt.err (!%p1413_p5)
}
 0x381   : > { %1211 = dma.vmem_to_hbm [thread:$0]  (%p1662_p10), %s1849_s18, 512, %s1847_s8, %s1865_s27, %s1524_s19, %s1524_s19, %s1525_s17   ;;  %v919_v50 = vcombine.low %v895_v44, %v911_v28  ;;  %v920_v30 = vcombine.high %v895_v44, %v911_v28  ;;  %v921_v31 = vcombine.low %v902_v27, %v918_v29  ;;  %v922_v33 = vcombine.high %v902_v27, %v918_v29 }
 0x382   : > { %s1896_s30 = scalar_lea.hbm %s1967_s7, %s1763_s16  ;;  %s1417_s18 = scalar_lea.vmem %s1900_s3, 512 }
 0x383   : > { %923 = vst.msk [vmem:[%s1856_s12] sm:$0xff] %vm611_vm2, %v919_v50  ;;  %924 = vst.msk [vmem:[%s1856_s12 + $0x8] sm:$0xff] %vm611_vm2, %v920_v30  ;;  %p1418_p9 = scmp.ne.s32.totalorder %s1900_s3, %s1417_s18  ;;  %s1527_s16 = smov [#allocation10]  }
 0x384   : > { %925 = vst.msk [vmem:[%s1856_s12 + $0x10] sm:$0xff] %vm611_vm2, %v921_v31  ;;  %926 = vst.msk [vmem:[%s1856_s12 + $0x18] sm:$0xff] %vm611_vm2, %v922_v33  ;;  %s1421_s8 = sshll.u32 %s1527_s16, 4  ;;  %s1422_s8 = int_to_ptr.vmem [resolvable:$false] %s1421_s8 }
 0x385   : > { %p1419_p1 = pnand %p1418_p9, %p1662_p10  ;;  %s1423_s15 = scalar_lea.vmem %s1422_s8, 1024 }
 0x386   : > { %p1424_p7 = scmp.lt.s32.totalorder %s1900_s3, %s1422_s8  ;;  %p1425_p3 = scmp.lt.s32.totalorder %s1423_s15, %s1417_s18 }
 0x387   : > { %p1420_p2 = pneg %p1419_p1 }
 0x388   : > { %p1426_p4 = por %p1425_p3, %p1424_p7 }
 0x38a   : > { %p1427_p13 = pnand %p1426_p4, %p1420_p2 }
 0x38c   : > { %1430 = shalt.err (!%p1427_p13)
}
 0x38d   : > { %s1431_s12 = scalar_lea.hbm %s1896_s30, 512  ;;  %s1435_s20 = scalar_lea.hbm %s1967_s7, 1024 }
 0x38e   : > { %p1432_p6 = scmp.ne.s32.totalorder %s1896_s30, %s1431_s12  ;;  %p1436_p11 = scmp.lt.u32.totalorder %s1896_s30, %s1967_s7 }
 0x38f   : > { %p1437_p0 = scmp.lt.u32.totalorder %s1435_s20, %s1431_s12  ;;  %p1439_p9 = scmp.lt.u32.totalorder %s1431_s12, %s1896_s30 }
 0x390   : > { %p1433_p8 = pnand %p1432_p6, %p1662_p10 }
 0x391   : > { %p1438_p5 = por %p1437_p0, %p1436_p11 }
 0x392   : > { %p1434_p12 = pneg %p1433_p8 }
 0x393   : > { %p1440_p1 = por %p1439_p9, %p1438_p5 }
 0x395   : > { %p1441_p2 = pnand %p1440_p1, %p1434_p12 }
 0x397   : > { %1444 = shalt.err (!%p1441_p2)
}
 0x398   : > { %1212 = dma.vmem_to_hbm [thread:$0]  (%p1662_p10), %s1900_s3, 512, %s1896_s30, %s1865_s27, %s1524_s19, %s1524_s19, %s1525_s17  }
 0x399 PF: > { %s1001_s9 = sand.u32 1, %s1487_s24   ;;  %p1988_p7 = scmp.ne.s32.totalorder %s1975_s10, 0 }
 0x39a   : > { %p1989_p3 = scmp.ge.s32.totalorder %s1507_s29, 2  ;;  %s1002_s18 = scalar_lea.sflag [#allocation4], %s1001_s9 }
 0x39c   : > { %p1225_p4 = pnand %p1989_p3, %p1988_p7 }
 0x39e   : > { %1478 = dma.done.wait (!%p1225_p4), %s1002_s18, 512  }
 0x39f   : > { %1480 = vsyncadd (!%p1225_p4), %s1002_s18, 4294966784  ;;  %s1990_s21 = sadd.s32 4294967294, %s1507_s29  }
 0x3a0   : > { %s1010_s16 = sand.u32 1, %s1990_s21  }
 0x3a1   : > { %s1011_s8 = scalar_lea.sflag [#allocation9], %s1010_s16 }
 0x3a2   : > { %1482 = dma.done.wait (!%p1225_p4), %s1011_s8, 1024  }
 0x3a3   : > { %1484 = vsyncadd (!%p1225_p4), %s1011_s8, 4294966272  ;;  %s28_s29 = sadd.s32 1, %s1507_s29   ;;  %s1991_s19 = sld [smem:[#allocation15_spill]] }
 0x3a4   : > { %p25_p10 = scmp.ge.s32.totalorder %s28_s29, 4   ;;  %s1992_s24 = smov %s1491_s25 }
 0x3a5   : > { %s1993_s25 = smov %s1495_s26  ;;  %s1994_s26 = smov %s1671_s23 }
 0x3a6   : > { %s1995_s27 = smov %s1503_s28  ;;  %27 = sbr.rel (!%p25_p10) target bundleno = 11 (0xb), region = 121 }
 0x3a9   : > { %s1996_s28 = smov %s1991_s19 }
 0x3ad   :  { %1025 = vsyncpa [#allocation3], 1 }
 0x3ae   :  { %1027 = vsyncpa [#allocation3 + $0x1], 1 }
 0x3af   :  { %1028 = vsyncpa [#allocation6], 1 }
 0x3b0   :  { %1029 = vsyncpa [#allocation4], 1 }
 0x3b1   :  { %1031 = vsyncpa [#allocation4 + $0x1], 1 }
 0x3b2   :  { %1032 = vsyncpa [#allocation9], 1 }
 0x3b3   :  { %1034 = vsyncpa [#allocation9 + $0x1], 1 }

</bundles_post_ra>
